<compile_context>
chip_gen: v7x
topology: tpu7x:2x2x1
jax: 0.10.0
libtpu: 0.0.40
codegen_flags: <defaults>
</compile_context>

<pallas_src>
import functools
import math

import jax
import jax.numpy as jnp
from jax import lax
from jax.experimental import pallas as pl
from jax.experimental.pallas import tpu as pltpu


_SQRT1_2 = 0.7071067811865476
_VMEM_LIMIT = 48 * 1024 * 1024       # explicit budget: headroom inside v7x's 64 MiB physical VMEM


def _round_up(x, m):
    return ((x + m - 1) // m) * m


def _largest_divisor_leq(n, cap):
    for d in range(min(n, cap), 0, -1):
        if n % d == 0:
            return d
    return 1


def _sigmoid(x):
    # Single-transcendental sigmoid: 0.5*(1 + tanh(x/2)) == logistic(x).
    # Keeps EUP pressure down in the serial recurrence (matters on v5e).
    return 0.5 * (jnp.tanh(0.5 * x) + 1.0)


# --------------------------------------------------------------------------
# Kernel 1: LayerNorm(D) + exact GELU, tiled over rows (full D per block).
# --------------------------------------------------------------------------
def _erf_f32(x):
    # Abramowitz & Stegun 7.1.26 rational approximation, |abs err| < 1.5e-7 (i.e. exact
    # at f32 working precision).  Uses only add/mul/exp/select so it lowers under Mosaic.
    # TODO(synk): lax.erf has no guaranteed TPU-Pallas lowering; this stands in for the
    #             exact erf used by PyTorch's default (non-tanh) GELU.
    a = jnp.abs(x)
    t = 1.0 / (1.0 + 0.3275911 * a)
    poly = t * (0.254829592 + t * (-0.284496736 + t * (1.421413741
             + t * (-1.453152027 + t * 1.061405429))))
    v = 1.0 - poly * jnp.exp(-a * a)
    return jnp.where(x < 0.0, -v, v)


def _prenorm_gelu_kernel(x_ref, g_ref, b_ref, o_ref):
    x = x_ref[...].astype(jnp.float32)                               # (rows, D)
    mean = jnp.mean(x, axis=-1, keepdims=True)
    var = jnp.mean(jnp.square(x - mean), axis=-1, keepdims=True)     # biased var (PyTorch LN)
    y = (x - mean) * lax.rsqrt(var + 1e-5) * g_ref[...] + b_ref[...]
    o_ref[...] = 0.5 * y * (1.0 + _erf_f32(y * _SQRT1_2))            # exact GELU


def prenorm_gelu_rows(x2, gamma, beta):
    """LayerNorm over D + GELU on a flat (rows, D) slab, tiled over rows."""
    N, D = x2.shape
    # 512-row tiles already hit ~85% of HBM roofline and (double-buffered in+out) fit
    # v5e's 16 MiB default scoped VMEM for D up to ~2048.
    rows = N if N <= 512 else 512
    return pl.pallas_call(
        _prenorm_gelu_kernel,
        out_shape=jax.ShapeDtypeStruct((N, D), jnp.float32),
        grid=(pl.cdiv(N, rows),),
        in_specs=[
            pl.BlockSpec((rows, D), lambda i: (i, 0)),
            pl.BlockSpec((1, D), lambda i: (0, 0)),
            pl.BlockSpec((1, D), lambda i: (0, 0)),
        ],
        out_specs=pl.BlockSpec((rows, D), lambda i: (i, 0)),
        compiler_params=pltpu.CompilerParams(
            dimension_semantics=("parallel",)),
    )(x2, gamma.reshape(1, D), beta.reshape(1, D))


# --------------------------------------------------------------------------
# Kernel 2: hoisted input projection GX = X @ Wih[d] + bias[d], bf16 MXU, f32 acc.
#   x:    (TB, Din)  f32   time-major rows (row = t*Bp + b)
#   wih:  (2, Din, 4H) bf16   per-direction packed input->gate weights ([i|f|g|o])
#   bias: (2, 1, 4H)  f32     folded b_ih + b_hh per direction
#   out:  (2, TB, 4H) f32
# --------------------------------------------------------------------------
def _gx_matmul_kernel(x_ref, w_ref, b_ref, o_ref):
    x = x_ref[...].astype(jnp.bfloat16)                              # bf16 MXU operands
    o_ref[0] = (jnp.dot(x, w_ref[0], preferred_element_type=jnp.float32)
                + b_ref[0])                                          # f32 accumulation + bias


def gx_matmul(x2, wih, bias):
    TB, Din = x2.shape
    _, _, G4 = wih.shape
    tm = TB if TB <= 512 else 512
    return pl.pallas_call(
        _gx_matmul_kernel,
        out_shape=jax.ShapeDtypeStruct((2, TB, G4), jnp.float32),
        grid=(2, pl.cdiv(TB, tm)),
        in_specs=[
            pl.BlockSpec((tm, Din), lambda d, i: (i, 0)),
            pl.BlockSpec((1, Din, G4), lambda d, i: (d, 0, 0)),
            pl.BlockSpec((1, 1, G4), lambda d, i: (d, 0, 0)),
        ],
        out_specs=pl.BlockSpec((1, tm, G4), lambda d, i: (d, i, 0)),
        compiler_params=pltpu.CompilerParams(
            dimension_semantics=("parallel", "parallel"),
            vmem_limit_bytes=_VMEM_LIMIT),
    )(x2, wih, bias)


# --------------------------------------------------------------------------
# Kernel 3: bidirectional LSTM recurrence.
#   grid = (direction, time-chunk); h/c carried in VMEM scratch across chunks.
#   gx_ref: (1, ch*Bp, 4H)  this direction's input projections for the chunk it consumes
#                           (forward: chunk c; backward: mirror chunk nC-1-c)
#   whh_ref:(1, H, 4H) bf16 this direction's recurrent weights
#   o_ref:  (1, ch*Bp, H)   this direction's hidden states, written time-aligned
# --------------------------------------------------------------------------
def _bilstm_recurrence_kernel(gx_ref, whh_ref, o_ref, h_scr, c_scr, *,
                              T_chunk, Bp, H):
    d = pl.program_id(0)                       # direction: 0 = forward, 1 = backward
    c_idx = pl.program_id(1)                   # time chunk (in processing order)
    doff = pl.multiple_of(d * Bp, Bp)          # this direction's slice of the h/c scratch

    @pl.when(c_idx == 0)
    def _():
        h_scr[pl.ds(doff, Bp), :] = jnp.zeros((Bp, H), jnp.float32)
        c_scr[pl.ds(doff, Bp), :] = jnp.zeros((Bp, H), jnp.float32)

    whh = whh_ref[0]                           # (H, 4H) bf16, loaded once per chunk

    def _step(j, carry):
        # Forward walks the chunk 0..ch-1; backward walks its (mirror) chunk ch-1..0, so
        # both the GX load and the output store are single contiguous, time-aligned blocks.
        jl = d * (T_chunk - 1 - 2 * j) + j     # j if fwd else T_chunk-1-j
        row = pl.multiple_of(jl * Bp, Bp)
        h = h_scr[pl.ds(doff, Bp), :]
        c_prev = c_scr[pl.ds(doff, Bp), :]
        gates = gx_ref[0, pl.ds(row, Bp), :] + jnp.dot(
            h.astype(jnp.bfloat16), whh, preferred_element_type=jnp.float32)  # (Bp, 4H)
        i_g = _sigmoid(gates[:, 0 * H:1 * H])  # PyTorch gate order [i, f, g, o]
        f_g = _sigmoid(gates[:, 1 * H:2 * H])
        g_g = jnp.tanh(gates[:, 2 * H:3 * H])
        o_g = _sigmoid(gates[:, 3 * H:4 * H])
        c_new = f_g * c_prev + i_g * g_g
        h_new = o_g * jnp.tanh(c_new)
        h_scr[pl.ds(doff, Bp), :] = h_new
        c_scr[pl.ds(doff, Bp), :] = c_new
        # TODO(synk): for H < 128 this store is lane-masked; production H >= 128 makes it
        #             lane-dense (padding H for the toy shape is not worth the repacking).
        o_ref[0, pl.ds(row, Bp), :] = h_new
        return carry

    lax.fori_loop(0, T_chunk, _step, 0, unroll=min(T_chunk, 8))


def bilstm_recurrence(gx, whh, T, Bp):
    _, TB, G4 = gx.shape
    H = G4 // 4
    # Chunk of timesteps per grid step: amortizes the ~0.35us/step grid overhead while
    # keeping per-step VMEM (2 GX chunk buffers + 2 output chunk buffers + weights + h/c)
    # far below the v7x budget.
    ch = _largest_divisor_leq(T, 16)
    nC = T // ch
    kernel = functools.partial(_bilstm_recurrence_kernel, T_chunk=ch, Bp=Bp, H=H)
    # Forward (d=0) consumes/produces chunk c; backward (d=1) chunk nC-1-c.
    chunk_map = lambda d, c: (d, d * (nC - 1 - 2 * c) + c, 0)
    return pl.pallas_call(
        kernel,
        out_shape=jax.ShapeDtypeStruct((2, TB, H), jnp.float32),
        grid=(2, nC),
        in_specs=[
            pl.BlockSpec((1, ch * Bp, G4), chunk_map),
            pl.BlockSpec((1, H, G4), lambda d, c: (d, 0, 0)),
        ],
        out_specs=pl.BlockSpec((1, ch * Bp, H), chunk_map),
        scratch_shapes=[pltpu.VMEM((2 * Bp, H), jnp.float32),   # h per direction
                        pltpu.VMEM((2 * Bp, H), jnp.float32)],  # c per direction
        compiler_params=pltpu.CompilerParams(
            # direction axis parallel -> the two directions go to the two TensorCores on
            # v7x; time axis is a true sequential carry.
            dimension_semantics=("parallel", "arbitrary"),
            vmem_limit_bytes=_VMEM_LIMIT),
    )(gx, whh)


# --------------------------------------------------------------------------
# Full module forward: norm -> gelu -> stacked bidirectional LSTM -> dropout(identity)
# --------------------------------------------------------------------------
def lstm_module_forward(x, params):
    """x: (B, T, input_size) -> (B, T, 2*hidden_size)  (PyTorch batch_first layout)."""
    B, T, D = x.shape
    H = params["layers"][0]["whh"].shape[1]
    Bp = _round_up(B, 8)                       # full sublanes; padded rows are independent

    xp = jnp.pad(x, ((0, Bp - B), (0, 0), (0, 0)))
    x2 = jnp.transpose(xp, (1, 0, 2)).reshape(T * Bp, D)    # time-major rows: row = t*Bp + b
    cur = prenorm_gelu_rows(x2, params["ln_gamma"], params["ln_beta"])

    for layer in params["layers"]:
        gx = gx_matmul(cur, layer["wih"], layer["b"])        # (2, T*Bp, 4H)
        hid = bilstm_recurrence(gx, layer["whh"], T, Bp)     # (2, T*Bp, H), time-aligned
        cur = jnp.concatenate([hid[0], hid[1]], axis=-1)     # (T*Bp, 2H) = [h_fwd | h_bwd]

    out = cur.reshape(T, Bp, 2 * H)[:, :B]
    # self.dropout: identity at inference.
    return jnp.transpose(out, (1, 0, 2))


# --------------------------------------------------------------------------
# Parameter init (mirrors PyTorch nn.LSTM shapes/init) + packing.
#   wih[d] = W_ih^T  (Din, 4H), columns in PyTorch gate order [i | f | g | o]
#   whh[d] = W_hh^T  (H, 4H)
#   b[d]   = b_ih + b_hh  (1, 4H)
# --------------------------------------------------------------------------
def _pack_direction(w_ih, w_hh, b_ih, b_hh):
    return jnp.transpose(w_ih), jnp.transpose(w_hh), (b_ih + b_hh).reshape(1, -1)


def init_params(key, input_size, hidden_size, num_layers):
    H = hidden_size
    k = 1.0 / math.sqrt(H)
    params = {
        "ln_gamma": jnp.ones((input_size,), jnp.float32),
        "ln_beta": jnp.zeros((input_size,), jnp.float32),
        "layers": [],
    }
    for layer in range(num_layers):
        din = input_size if layer == 0 else 2 * H
        packed = []
        for _ in range(2):                                   # forward, backward
            key, k1, k2, k3, k4 = jax.random.split(key, 5)
            w_ih = jax.random.uniform(k1, (4 * H, din), jnp.float32, -k, k)
            w_hh = jax.random.uniform(k2, (4 * H, H), jnp.float32, -k, k)
            b_ih = jax.random.uniform(k3, (4 * H,), jnp.float32, -k, k)
            b_hh = jax.random.uniform(k4, (4 * H,), jnp.float32, -k, k)
            packed.append(_pack_direction(w_ih, w_hh, b_ih, b_hh))
        wih = jnp.stack([p[0] for p in packed]).astype(jnp.bfloat16)   # (2, din, 4H)
        whh = jnp.stack([p[1] for p in packed]).astype(jnp.bfloat16)   # (2, H, 4H)
        b = jnp.stack([p[2] for p in packed]).astype(jnp.float32)      # (2, 1, 4H)
        params["layers"].append({"wih": wih, "whh": whh, "b": b})
    return params


if __name__ == "__main__":
    # batch=2, seq=8, input_size=16, hidden_size=32, num_layers=2, dropout=0.1 (identity).
    B, T, D, H, L = 2, 8, 16, 32, 2

    key = jax.random.PRNGKey(0)
    kx, kp = jax.random.split(key)
    x = jax.random.normal(kx, (B, T, D), dtype=jnp.float32)
    params = init_params(kp, D, H, L)

    fwd = jax.jit(lstm_module_forward)
    out = fwd(x, params)
    jax.block_until_ready(out)

    assert out.shape == (B, T, 2 * H), out.shape
    assert out.dtype == jnp.float32
    assert bool(jnp.all(jnp.isfinite(out)))
    print("KERNEL_OK")
</pallas_src>

<mosaic_0001>
module attributes {stable_mosaic.version = 11 : i64} {
  func.func @_gx_matmul_kernel(%arg0: i32, %arg1: i32, %arg2: memref<64x16xf32, #tpu.memory_space<vmem>>, %arg3: memref<1x16x128xbf16, #tpu.memory_space<vmem>>, %arg4: memref<1x1x128xf32, #tpu.memory_space<vmem>>, %arg5: memref<1x64x128xf32, #tpu.memory_space<vmem>>) attributes {dimension_semantics = [#tpu.dimension_semantics<parallel>, #tpu.dimension_semantics<parallel>], iteration_bounds = array<i64: 2, 1>, scalar_prefetch = 0 : i64, scratch_operands = 0 : i64, tpu.core_type = #tpu.core_type<tc>, window_params = [{transform_indices = @transform_0, window_bounds = array<i64: 64, 16>}, {transform_indices = @transform_1, window_bounds = array<i64: 1, 16, 128>}, {transform_indices = @transform_2, window_bounds = array<i64: 1, 1, 128>}, {transform_indices = @transform_3, window_bounds = array<i64: 1, 64, 128>}]} {
    %c0 = arith.constant 0 : index
    %c0_0 = arith.constant 0 : index
    %0 = vector.load %arg2[%c0, %c0_0] : memref<64x16xf32, #tpu.memory_space<vmem>>, vector<64x16xf32>
    %1 = arith.truncf %0 : vector<64x16xf32> to vector<64x16xbf16>
    %c0_1 = arith.constant 0 : index
    %c0_2 = arith.constant 0 : index
    %c0_3 = arith.constant 0 : index
    %2 = vector.load %arg3[%c0_1, %c0_2, %c0_3] : memref<1x16x128xbf16, #tpu.memory_space<vmem>>, vector<1x16x128xbf16>
    %3 = vector.shape_cast %2 : vector<1x16x128xbf16> to vector<16x128xbf16>
    %cst = arith.constant dense<0.000000e+00> : vector<64x128xf32>
    %4 = tpu.matmul %1, %3, %cst {dimension_numbers = #tpu.dot_dimension_numbers<[1], [0], [0], [1], [0, 0, 1, 1], [], []>} : vector<64x16xbf16>, vector<16x128xbf16>, vector<64x128xf32> -> vector<64x128xf32>
    %c0_4 = arith.constant 0 : index
    %c0_5 = arith.constant 0 : index
    %c0_6 = arith.constant 0 : index
    %5 = vector.load %arg4[%c0_4, %c0_5, %c0_6] : memref<1x1x128xf32, #tpu.memory_space<vmem>>, vector<1x1x128xf32>
    %6 = vector.shape_cast %5 : vector<1x1x128xf32> to vector<1x128xf32>
    %7 = vector.broadcast %6 : vector<1x128xf32> to vector<64x128xf32>
    %8 = arith.addf %4, %7 : vector<64x128xf32>
    %c0_7 = arith.constant 0 : index
    %c0_8 = arith.constant 0 : index
    %c0_9 = arith.constant 0 : index
    %9 = vector.load %arg5[%c0_7, %c0_8, %c0_9] : memref<1x64x128xf32, #tpu.memory_space<vmem>>, vector<1x64x128xf32>
    %10 = vector.shape_cast %9 : vector<1x64x128xf32> to vector<64x128xf32>
    %11 = vector.shape_cast %8 : vector<64x128xf32> to vector<1x64x128xf32>
    tpu.vector_store %arg5[%c0_7, %c0_8, %c0_9], %11 {strides = array<i32>} : memref<1x64x128xf32, #tpu.memory_space<vmem>>, vector<1x64x128xf32>,
    return
  }
  func.func @transform_0(%arg0: i32, %arg1: i32) -> (i32, i32) {
    %c0_i32 = arith.constant 0 : i32
    %c0_i32_0 = arith.constant 0 : i32
    return %arg1, %c0_i32 : i32, i32
  }
  func.func @transform_1(%arg0: i32, %arg1: i32) -> (i32, i32, i32) {
    %c0_i32 = arith.constant 0 : i32
    %c0_i32_0 = arith.constant 0 : i32
    %c0_i32_1 = arith.constant 0 : i32
    return %arg0, %c0_i32, %c0_i32_0 : i32, i32, i32
  }
  func.func @transform_2(%arg0: i32, %arg1: i32) -> (i32, i32, i32) {
    %c0_i32 = arith.constant 0 : i32
    %c0_i32_0 = arith.constant 0 : i32
    %c0_i32_1 = arith.constant 0 : i32
    return %arg0, %c0_i32, %c0_i32_0 : i32, i32, i32
  }
  func.func @transform_3(%arg0: i32, %arg1: i32) -> (i32, i32, i32) {
    %c0_i32 = arith.constant 0 : i32
    %c0_i32_0 = arith.constant 0 : i32
    return %arg0, %arg1, %c0_i32 : i32, i32, i32
  }
}

module attributes {stable_mosaic.version = 11 : i64} {
  func.func @_prenorm_gelu_kernel(%arg0: i32, %arg1: memref<64x16xf32, #tpu.memory_space<vmem>>, %arg2: memref<1x16xf32, #tpu.memory_space<vmem>>, %arg3: memref<1x16xf32, #tpu.memory_space<vmem>>, %arg4: memref<64x16xf32, #tpu.memory_space<vmem>>) attributes {dimension_semantics = [#tpu.dimension_semantics<parallel>], iteration_bounds = array<i64: 1>, scalar_prefetch = 0 : i64, scratch_operands = 0 : i64, tpu.core_type = #tpu.core_type<tc>, window_params = [{transform_indices = @transform_0, window_bounds = array<i64: 64, 16>}, {pipeline_mode = #tpu.pipeline_mode<synchronous>, transform_indices = @transform_1, window_bounds = array<i64: 1, 16>}, {pipeline_mode = #tpu.pipeline_mode<synchronous>, transform_indices = @transform_2, window_bounds = array<i64: 1, 16>}, {transform_indices = @transform_3, window_bounds = array<i64: 64, 16>}]} {
    %c0 = arith.constant 0 : index
    %c0_0 = arith.constant 0 : index
    %0 = vector.load %arg1[%c0, %c0_0] : memref<64x16xf32, #tpu.memory_space<vmem>>, vector<64x16xf32>
    %cst = arith.constant dense<0.000000e+00> : vector<64xf32>
    %1 = vector.multi_reduction <add>, %0, %cst [1] : vector<64x16xf32> to vector<64xf32>
    %2 = vector.shape_cast %1 : vector<64xf32> to vector<64x1xf32>
    %cst_1 = arith.constant 1.600000e+01 : f32
    %3 = vector.broadcast %cst_1 : f32 to vector<64x1xf32>
    %4 = arith.divf %2, %3 : vector<64x1xf32>
    %5 = vector.broadcast %4 : vector<64x1xf32> to vector<64x16xf32>
    %6 = arith.subf %0, %5 : vector<64x16xf32>
    %7 = arith.mulf %6, %6 : vector<64x16xf32>
    %cst_2 = arith.constant dense<0.000000e+00> : vector<64xf32>
    %8 = vector.multi_reduction <add>, %7, %cst_2 [1] : vector<64x16xf32> to vector<64xf32>
    %9 = vector.shape_cast %8 : vector<64xf32> to vector<64x1xf32>
    %cst_3 = arith.constant 1.600000e+01 : f32
    %10 = vector.broadcast %cst_3 : f32 to vector<64x1xf32>
    %11 = arith.divf %9, %10 : vector<64x1xf32>
    %12 = vector.broadcast %4 : vector<64x1xf32> to vector<64x16xf32>
    %13 = arith.subf %0, %12 : vector<64x16xf32>
    %cst_4 = arith.constant 9.99999974E-6 : f32
    %14 = vector.broadcast %cst_4 : f32 to vector<64x1xf32>
    %15 = arith.addf %11, %14 : vector<64x1xf32>
    %16 = math.rsqrt %15 : vector<64x1xf32>
    %17 = vector.broadcast %16 : vector<64x1xf32> to vector<64x16xf32>
    %18 = arith.mulf %13, %17 : vector<64x16xf32>
    %c0_5 = arith.constant 0 : index
    %c0_6 = arith.constant 0 : index
    %19 = vector.load %arg2[%c0_5, %c0_6] : memref<1x16xf32, #tpu.memory_space<vmem>>, vector<1x16xf32>
    %20 = vector.broadcast %19 : vector<1x16xf32> to vector<64x16xf32>
    %21 = arith.mulf %18, %20 : vector<64x16xf32>
    %c0_7 = arith.constant 0 : index
    %c0_8 = arith.constant 0 : index
    %22 = vector.load %arg3[%c0_7, %c0_8] : memref<1x16xf32, #tpu.memory_space<vmem>>, vector<1x16xf32>
    %23 = vector.broadcast %22 : vector<1x16xf32> to vector<64x16xf32>
    %24 = arith.addf %21, %23 : vector<64x16xf32>
    %cst_9 = arith.constant 5.000000e-01 : f32
    %25 = vector.broadcast %cst_9 : f32 to vector<64x16xf32>
    %26 = arith.mulf %25, %24 : vector<64x16xf32>
    %cst_10 = arith.constant 0.707106769 : f32
    %27 = vector.broadcast %cst_10 : f32 to vector<64x16xf32>
    %28 = arith.mulf %24, %27 : vector<64x16xf32>
    %29 = math.absf %28 : vector<64x16xf32>
    %cst_11 = arith.constant 0.327591091 : f32
    %30 = vector.broadcast %cst_11 : f32 to vector<64x16xf32>
    %31 = arith.mulf %30, %29 : vector<64x16xf32>
    %cst_12 = arith.constant 1.000000e+00 : f32
    %32 = vector.broadcast %cst_12 : f32 to vector<64x16xf32>
    %33 = arith.addf %32, %31 : vector<64x16xf32>
    %cst_13 = arith.constant 1.000000e+00 : f32
    %34 = vector.broadcast %cst_13 : f32 to vector<64x16xf32>
    %35 = arith.divf %34, %33 : vector<64x16xf32>
    %cst_14 = arith.constant 1.06140542 : f32
    %36 = vector.broadcast %cst_14 : f32 to vector<64x16xf32>
    %37 = arith.mulf %35, %36 : vector<64x16xf32>
    %cst_15 = arith.constant -1.45315206 : f32
    %38 = vector.broadcast %cst_15 : f32 to vector<64x16xf32>
    %39 = arith.addf %38, %37 : vector<64x16xf32>
    %40 = arith.mulf %35, %39 : vector<64x16xf32>
    %cst_16 = arith.constant 1.42141378 : f32
    %41 = vector.broadcast %cst_16 : f32 to vector<64x16xf32>
    %42 = arith.addf %41, %40 : vector<64x16xf32>
    %43 = arith.mulf %35, %42 : vector<64x16xf32>
    %cst_17 = arith.constant -0.284496725 : f32
    %44 = vector.broadcast %cst_17 : f32 to vector<64x16xf32>
    %45 = arith.addf %44, %43 : vector<64x16xf32>
    %46 = arith.mulf %35, %45 : vector<64x16xf32>
    %cst_18 = arith.constant 0.254829586 : f32
    %47 = vector.broadcast %cst_18 : f32 to vector<64x16xf32>
    %48 = arith.addf %47, %46 : vector<64x16xf32>
    %49 = arith.mulf %35, %48 : vector<64x16xf32>
    %cst_19 = arith.constant 0.000000e+00 : f32
    %50 = vector.broadcast %cst_19 : f32 to vector<64x16xf32>
    %51 = arith.subf %50, %29 : vector<64x16xf32>
    %52 = arith.mulf %51, %29 : vector<64x16xf32>
    %53 = math.exp %52 : vector<64x16xf32>
    %54 = arith.mulf %49, %53 : vector<64x16xf32>
    %cst_20 = arith.constant 1.000000e+00 : f32
    %55 = vector.broadcast %cst_20 : f32 to vector<64x16xf32>
    %56 = arith.subf %55, %54 : vector<64x16xf32>
    %cst_21 = arith.constant 0.000000e+00 : f32
    %57 = vector.broadcast %cst_21 : f32 to vector<64x16xf32>
    %58 = arith.cmpf olt, %28, %57 : vector<64x16xf32>
    %cst_22 = arith.constant 0.000000e+00 : f32
    %59 = vector.broadcast %cst_22 : f32 to vector<64x16xf32>
    %60 = arith.subf %59, %56 : vector<64x16xf32>
    %61 = arith.select %58, %60, %56 : vector<64x16xi1>, vector<64x16xf32>
    %cst_23 = arith.constant 1.000000e+00 : f32
    %62 = vector.broadcast %cst_23 : f32 to vector<64x16xf32>
    %63 = arith.addf %62, %61 : vector<64x16xf32>
    %64 = arith.mulf %26, %63 : vector<64x16xf32>
    %c0_24 = arith.constant 0 : index
    %c0_25 = arith.constant 0 : index
    %65 = vector.load %arg4[%c0_24, %c0_25] : memref<64x16xf32, #tpu.memory_space<vmem>>, vector<64x16xf32>
    tpu.vector_store %arg4[%c0_24, %c0_25], %64 {strides = array<i32>} : memref<64x16xf32, #tpu.memory_space<vmem>>, vector<64x16xf32>,
    return
  }
  func.func @transform_0(%arg0: i32) -> (i32, i32) {
    %c0_i32 = arith.constant 0 : i32
    %c0_i32_0 = arith.constant 0 : i32
    return %arg0, %c0_i32 : i32, i32
  }
  func.func @transform_1(%arg0: i32) -> (i32, i32) {
    %c0_i32 = arith.constant 0 : i32
    %c0_i32_0 = arith.constant 0 : i32
    %c0_i32_1 = arith.constant 0 : i32
    return %c0_i32, %c0_i32_0 : i32, i32
  }
  func.func @transform_2(%arg0: i32) -> (i32, i32) {
    %c0_i32 = arith.constant 0 : i32
    %c0_i32_0 = arith.constant 0 : i32
    %c0_i32_1 = arith.constant 0 : i32
    return %c0_i32, %c0_i32_0 : i32, i32
  }
  func.func @transform_3(%arg0: i32) -> (i32, i32) {
    %c0_i32 = arith.constant 0 : i32
    %c0_i32_0 = arith.constant 0 : i32
    return %arg0, %c0_i32 : i32, i32
  }
}

module attributes {stable_mosaic.version = 11 : i64} {
  func.func @_bilstm_recurrence_kernel(%arg0: i32, %arg1: i32, %arg2: memref<1x64x128xf32, #tpu.memory_space<vmem>>, %arg3: memref<1x32x128xbf16, #tpu.memory_space<vmem>>, %arg4: memref<1x64x32xf32, #tpu.memory_space<vmem>>, %arg5: memref<16x32xf32, #tpu.memory_space<vmem>>, %arg6: memref<16x32xf32, #tpu.memory_space<vmem>>) attributes {dimension_semantics = [#tpu.dimension_semantics<parallel>, #tpu.dimension_semantics<arbitrary>], iteration_bounds = array<i64: 2, 1>, scalar_prefetch = 0 : i64, scratch_operands = 2 : i64, tpu.core_type = #tpu.core_type<tc>, window_params = [{transform_indices = @transform_0, window_bounds = array<i64: 1, 64, 128>}, {transform_indices = @transform_1, window_bounds = array<i64: 1, 32, 128>}, {transform_indices = @transform_2, window_bounds = array<i64: 1, 64, 32>}]} {
    %c8_i32 = arith.constant 8 : i32
    %0 = arith.muli %arg0, %c8_i32 : i32
    %1 = tpu.assume_multiple %0, 8 : i32
    %c0_i32 = arith.constant 0 : i32
    %2 = arith.cmpi eq, %arg1, %c0_i32 : i32
    %3 = arith.extui %2 : i1 to i32
    %c0_i32_0 = arith.constant 0 : i32
    %4 = arith.cmpi ne, %3, %c0_i32_0 : i32
    scf.if %4 {
      %cst_172 = arith.constant 0.000000e+00 : f32
      %447 = vector.broadcast %cst_172 : f32 to vector<8x32xf32>
      %448 = arith.index_cast %1 : i32 to index
      %c0_173 = arith.constant 0 : index
      %449 = vector.load %arg5[%448, %c0_173] : memref<16x32xf32, #tpu.memory_space<vmem>>, vector<8x32xf32>
      tpu.vector_store %arg5[%448, %c0_173], %447 {strides = array<i32>} : memref<16x32xf32, #tpu.memory_space<vmem>>, vector<8x32xf32>,
      %cst_174 = arith.constant 0.000000e+00 : f32
      %450 = vector.broadcast %cst_174 : f32 to vector<8x32xf32>
      %451 = arith.index_cast %1 : i32 to index
      %c0_175 = arith.constant 0 : index
      %452 = vector.load %arg6[%451, %c0_175] : memref<16x32xf32, #tpu.memory_space<vmem>>, vector<8x32xf32>
      tpu.vector_store %arg6[%451, %c0_175], %450 {strides = array<i32>} : memref<16x32xf32, #tpu.memory_space<vmem>>, vector<8x32xf32>,
    } else {
    }
    %c0 = arith.constant 0 : index
    %c0_1 = arith.constant 0 : index
    %c0_2 = arith.constant 0 : index
    %5 = vector.load %arg3[%c0, %c0_1, %c0_2] : memref<1x32x128xbf16, #tpu.memory_space<vmem>>, vector<1x32x128xbf16>
    %6 = vector.shape_cast %5 : vector<1x32x128xbf16> to vector<32x128xbf16>
    %c0_i32_3 = arith.constant 0 : i32
    %c2_i32 = arith.constant 2 : i32
    %7 = arith.muli %c2_i32, %c0_i32_3 : i32
    %c7_i32 = arith.constant 7 : i32
    %8 = arith.subi %c7_i32, %7 : i32
    %9 = arith.muli %arg0, %8 : i32
    %10 = arith.addi %9, %c0_i32_3 : i32
    %c8_i32_4 = arith.constant 8 : i32
    %11 = arith.muli %10, %c8_i32_4 : i32
    %12 = tpu.assume_multiple %11, 8 : i32
    %13 = arith.index_cast %1 : i32 to index
    %c0_5 = arith.constant 0 : index
    %14 = vector.load %arg5[%13, %c0_5] : memref<16x32xf32, #tpu.memory_space<vmem>>, vector<8x32xf32>
    %15 = arith.index_cast %1 : i32 to index
    %c0_6 = arith.constant 0 : index
    %16 = vector.load %arg6[%15, %c0_6] : memref<16x32xf32, #tpu.memory_space<vmem>>, vector<8x32xf32>
    %c0_7 = arith.constant 0 : index
    %17 = arith.index_cast %12 : i32 to index
    %c0_8 = arith.constant 0 : index
    %18 = vector.load %arg2[%c0_7, %17, %c0_8] : memref<1x64x128xf32, #tpu.memory_space<vmem>>, vector<1x8x128xf32>
    %19 = vector.shape_cast %18 : vector<1x8x128xf32> to vector<8x128xf32>
    %20 = arith.truncf %14 : vector<8x32xf32> to vector<8x32xbf16>
    %cst = arith.constant dense<0.000000e+00> : vector<8x128xf32>
    %21 = tpu.matmul %20, %6, %cst {dimension_numbers = #tpu.dot_dimension_numbers<[1], [0], [0], [1], [0, 0, 1, 1], [], []>} : vector<8x32xbf16>, vector<32x128xbf16>, vector<8x128xf32> -> vector<8x128xf32>
    %22 = arith.addf %19, %21 : vector<8x128xf32>
    %23 = vector.extract_strided_slice %22 {offsets = [0, 0], sizes = [8, 32], strides = [1, 1]} : vector<8x128xf32> to vector<8x32xf32>
    %cst_9 = arith.constant 5.000000e-01 : f32
    %24 = vector.broadcast %cst_9 : f32 to vector<8x32xf32>
    %25 = arith.mulf %24, %23 : vector<8x32xf32>
    %26 = math.tanh %25 : vector<8x32xf32>
    %cst_10 = arith.constant 1.000000e+00 : f32
    %27 = vector.broadcast %cst_10 : f32 to vector<8x32xf32>
    %28 = arith.addf %26, %27 : vector<8x32xf32>
    %cst_11 = arith.constant 5.000000e-01 : f32
    %29 = vector.broadcast %cst_11 : f32 to vector<8x32xf32>
    %30 = arith.mulf %29, %28 : vector<8x32xf32>
    %31 = vector.extract_strided_slice %22 {offsets = [0, 32], sizes = [8, 32], strides = [1, 1]} : vector<8x128xf32> to vector<8x32xf32>
    %cst_12 = arith.constant 5.000000e-01 : f32
    %32 = vector.broadcast %cst_12 : f32 to vector<8x32xf32>
    %33 = arith.mulf %32, %31 : vector<8x32xf32>
    %34 = math.tanh %33 : vector<8x32xf32>
    %cst_13 = arith.constant 1.000000e+00 : f32
    %35 = vector.broadcast %cst_13 : f32 to vector<8x32xf32>
    %36 = arith.addf %34, %35 : vector<8x32xf32>
    %cst_14 = arith.constant 5.000000e-01 : f32
    %37 = vector.broadcast %cst_14 : f32 to vector<8x32xf32>
    %38 = arith.mulf %37, %36 : vector<8x32xf32>
    %39 = vector.extract_strided_slice %22 {offsets = [0, 64], sizes = [8, 32], strides = [1, 1]} : vector<8x128xf32> to vector<8x32xf32>
    %40 = math.tanh %39 : vector<8x32xf32>
    %41 = vector.extract_strided_slice %22 {offsets = [0, 96], sizes = [8, 32], strides = [1, 1]} : vector<8x128xf32> to vector<8x32xf32>
    %cst_15 = arith.constant 5.000000e-01 : f32
    %42 = vector.broadcast %cst_15 : f32 to vector<8x32xf32>
    %43 = arith.mulf %42, %41 : vector<8x32xf32>
    %44 = math.tanh %43 : vector<8x32xf32>
    %cst_16 = arith.constant 1.000000e+00 : f32
    %45 = vector.broadcast %cst_16 : f32 to vector<8x32xf32>
    %46 = arith.addf %44, %45 : vector<8x32xf32>
    %cst_17 = arith.constant 5.000000e-01 : f32
    %47 = vector.broadcast %cst_17 : f32 to vector<8x32xf32>
    %48 = arith.mulf %47, %46 : vector<8x32xf32>
    %49 = arith.mulf %38, %16 : vector<8x32xf32>
    %50 = arith.mulf %30, %40 : vector<8x32xf32>
    %51 = arith.addf %49, %50 : vector<8x32xf32>
    %52 = math.tanh %51 : vector<8x32xf32>
    %53 = arith.mulf %48, %52 : vector<8x32xf32>
    %54 = arith.index_cast %1 : i32 to index
    %c0_18 = arith.constant 0 : index
    %55 = vector.load %arg5[%54, %c0_18] : memref<16x32xf32, #tpu.memory_space<vmem>>, vector<8x32xf32>
    tpu.vector_store %arg5[%54, %c0_18], %53 {strides = array<i32>} : memref<16x32xf32, #tpu.memory_space<vmem>>, vector<8x32xf32>,
    %56 = arith.index_cast %1 : i32 to index
    %c0_19 = arith.constant 0 : index
    %57 = vector.load %arg6[%56, %c0_19] : memref<16x32xf32, #tpu.memory_space<vmem>>, vector<8x32xf32>
    tpu.vector_store %arg6[%56, %c0_19], %51 {strides = array<i32>} : memref<16x32xf32, #tpu.memory_space<vmem>>, vector<8x32xf32>,
    %c0_20 = arith.constant 0 : index
    %58 = arith.index_cast %12 : i32 to index
    %c0_21 = arith.constant 0 : index
    %59 = vector.load %arg4[%c0_20, %58, %c0_21] : memref<1x64x32xf32, #tpu.memory_space<vmem>>, vector<1x8x32xf32>
    %60 = vector.shape_cast %59 : vector<1x8x32xf32> to vector<8x32xf32>
    %61 = vector.shape_cast %53 : vector<8x32xf32> to vector<1x8x32xf32>
    tpu.vector_store %arg4[%c0_20, %58, %c0_21], %61 {strides = array<i32>} : memref<1x64x32xf32, #tpu.memory_space<vmem>>, vector<1x8x32xf32>,
    %c1_i32 = arith.constant 1 : i32
    %c2_i32_22 = arith.constant 2 : i32
    %62 = arith.muli %c2_i32_22, %c1_i32 : i32
    %c7_i32_23 = arith.constant 7 : i32
    %63 = arith.subi %c7_i32_23, %62 : i32
    %64 = arith.muli %arg0, %63 : i32
    %65 = arith.addi %64, %c1_i32 : i32
    %c8_i32_24 = arith.constant 8 : i32
    %66 = arith.muli %65, %c8_i32_24 : i32
    %67 = tpu.assume_multiple %66, 8 : i32
    %68 = arith.index_cast %1 : i32 to index
    %c0_25 = arith.constant 0 : index
    %69 = vector.load %arg5[%68, %c0_25] : memref<16x32xf32, #tpu.memory_space<vmem>>, vector<8x32xf32>
    %70 = arith.index_cast %1 : i32 to index
    %c0_26 = arith.constant 0 : index
    %71 = vector.load %arg6[%70, %c0_26] : memref<16x32xf32, #tpu.memory_space<vmem>>, vector<8x32xf32>
    %c0_27 = arith.constant 0 : index
    %72 = arith.index_cast %67 : i32 to index
    %c0_28 = arith.constant 0 : index
    %73 = vector.load %arg2[%c0_27, %72, %c0_28] : memref<1x64x128xf32, #tpu.memory_space<vmem>>, vector<1x8x128xf32>
    %74 = vector.shape_cast %73 : vector<1x8x128xf32> to vector<8x128xf32>
    %75 = arith.truncf %69 : vector<8x32xf32> to vector<8x32xbf16>
    %cst_29 = arith.constant dense<0.000000e+00> : vector<8x128xf32>
    %76 = tpu.matmul %75, %6, %cst_29 {dimension_numbers = #tpu.dot_dimension_numbers<[1], [0], [0], [1], [0, 0, 1, 1], [], []>} : vector<8x32xbf16>, vector<32x128xbf16>, vector<8x128xf32> -> vector<8x128xf32>
    %77 = arith.addf %74, %76 : vector<8x128xf32>
    %78 = vector.extract_strided_slice %77 {offsets = [0, 0], sizes = [8, 32], strides = [1, 1]} : vector<8x128xf32> to vector<8x32xf32>
    %cst_30 = arith.constant 5.000000e-01 : f32
    %79 = vector.broadcast %cst_30 : f32 to vector<8x32xf32>
    %80 = arith.mulf %79, %78 : vector<8x32xf32>
    %81 = math.tanh %80 : vector<8x32xf32>
    %cst_31 = arith.constant 1.000000e+00 : f32
    %82 = vector.broadcast %cst_31 : f32 to vector<8x32xf32>
    %83 = arith.addf %81, %82 : vector<8x32xf32>
    %cst_32 = arith.constant 5.000000e-01 : f32
    %84 = vector.broadcast %cst_32 : f32 to vector<8x32xf32>
    %85 = arith.mulf %84, %83 : vector<8x32xf32>
    %86 = vector.extract_strided_slice %77 {offsets = [0, 32], sizes = [8, 32], strides = [1, 1]} : vector<8x128xf32> to vector<8x32xf32>
    %cst_33 = arith.constant 5.000000e-01 : f32
    %87 = vector.broadcast %cst_33 : f32 to vector<8x32xf32>
    %88 = arith.mulf %87, %86 : vector<8x32xf32>
    %89 = math.tanh %88 : vector<8x32xf32>
    %cst_34 = arith.constant 1.000000e+00 : f32
    %90 = vector.broadcast %cst_34 : f32 to vector<8x32xf32>
    %91 = arith.addf %89, %90 : vector<8x32xf32>
    %cst_35 = arith.constant 5.000000e-01 : f32
    %92 = vector.broadcast %cst_35 : f32 to vector<8x32xf32>
    %93 = arith.mulf %92, %91 : vector<8x32xf32>
    %94 = vector.extract_strided_slice %77 {offsets = [0, 64], sizes = [8, 32], strides = [1, 1]} : vector<8x128xf32> to vector<8x32xf32>
    %95 = math.tanh %94 : vector<8x32xf32>
    %96 = vector.extract_strided_slice %77 {offsets = [0, 96], sizes = [8, 32], strides = [1, 1]} : vector<8x128xf32> to vector<8x32xf32>
    %cst_36 = arith.constant 5.000000e-01 : f32
    %97 = vector.broadcast %cst_36 : f32 to vector<8x32xf32>
    %98 = arith.mulf %97, %96 : vector<8x32xf32>
    %99 = math.tanh %98 : vector<8x32xf32>
    %cst_37 = arith.constant 1.000000e+00 : f32
    %100 = vector.broadcast %cst_37 : f32 to vector<8x32xf32>
    %101 = arith.addf %99, %100 : vector<8x32xf32>
    %cst_38 = arith.constant 5.000000e-01 : f32
    %102 = vector.broadcast %cst_38 : f32 to vector<8x32xf32>
    %103 = arith.mulf %102, %101 : vector<8x32xf32>
    %104 = arith.mulf %93, %71 : vector<8x32xf32>
    %105 = arith.mulf %85, %95 : vector<8x32xf32>
    %106 = arith.addf %104, %105 : vector<8x32xf32>
    %107 = math.tanh %106 : vector<8x32xf32>
    %108 = arith.mulf %103, %107 : vector<8x32xf32>
    %109 = arith.index_cast %1 : i32 to index
    %c0_39 = arith.constant 0 : index
    %110 = vector.load %arg5[%109, %c0_39] : memref<16x32xf32, #tpu.memory_space<vmem>>, vector<8x32xf32>
    tpu.vector_store %arg5[%109, %c0_39], %108 {strides = array<i32>} : memref<16x32xf32, #tpu.memory_space<vmem>>, vector<8x32xf32>,
    %111 = arith.index_cast %1 : i32 to index
    %c0_40 = arith.constant 0 : index
    %112 = vector.load %arg6[%111, %c0_40] : memref<16x32xf32, #tpu.memory_space<vmem>>, vector<8x32xf32>
    tpu.vector_store %arg6[%111, %c0_40], %106 {strides = array<i32>} : memref<16x32xf32, #tpu.memory_space<vmem>>, vector<8x32xf32>,
    %c0_41 = arith.constant 0 : index
    %113 = arith.index_cast %67 : i32 to index
    %c0_42 = arith.constant 0 : index
    %114 = vector.load %arg4[%c0_41, %113, %c0_42] : memref<1x64x32xf32, #tpu.memory_space<vmem>>, vector<1x8x32xf32>
    %115 = vector.shape_cast %114 : vector<1x8x32xf32> to vector<8x32xf32>
    %116 = vector.shape_cast %108 : vector<8x32xf32> to vector<1x8x32xf32>
    tpu.vector_store %arg4[%c0_41, %113, %c0_42], %116 {strides = array<i32>} : memref<1x64x32xf32, #tpu.memory_space<vmem>>, vector<1x8x32xf32>,
    %c2_i32_43 = arith.constant 2 : i32
    %c2_i32_44 = arith.constant 2 : i32
    %117 = arith.muli %c2_i32_44, %c2_i32_43 : i32
    %c7_i32_45 = arith.constant 7 : i32
    %118 = arith.subi %c7_i32_45, %117 : i32
    %119 = arith.muli %arg0, %118 : i32
    %120 = arith.addi %119, %c2_i32_43 : i32
    %c8_i32_46 = arith.constant 8 : i32
    %121 = arith.muli %120, %c8_i32_46 : i32
    %122 = tpu.assume_multiple %121, 8 : i32
    %123 = arith.index_cast %1 : i32 to index
    %c0_47 = arith.constant 0 : index
    %124 = vector.load %arg5[%123, %c0_47] : memref<16x32xf32, #tpu.memory_space<vmem>>, vector<8x32xf32>
    %125 = arith.index_cast %1 : i32 to index
    %c0_48 = arith.constant 0 : index
    %126 = vector.load %arg6[%125, %c0_48] : memref<16x32xf32, #tpu.memory_space<vmem>>, vector<8x32xf32>
    %c0_49 = arith.constant 0 : index
    %127 = arith.index_cast %122 : i32 to index
    %c0_50 = arith.constant 0 : index
    %128 = vector.load %arg2[%c0_49, %127, %c0_50] : memref<1x64x128xf32, #tpu.memory_space<vmem>>, vector<1x8x128xf32>
    %129 = vector.shape_cast %128 : vector<1x8x128xf32> to vector<8x128xf32>
    %130 = arith.truncf %124 : vector<8x32xf32> to vector<8x32xbf16>
    %cst_51 = arith.constant dense<0.000000e+00> : vector<8x128xf32>
    %131 = tpu.matmul %130, %6, %cst_51 {dimension_numbers = #tpu.dot_dimension_numbers<[1], [0], [0], [1], [0, 0, 1, 1], [], []>} : vector<8x32xbf16>, vector<32x128xbf16>, vector<8x128xf32> -> vector<8x128xf32>
    %132 = arith.addf %129, %131 : vector<8x128xf32>
    %133 = vector.extract_strided_slice %132 {offsets = [0, 0], sizes = [8, 32], strides = [1, 1]} : vector<8x128xf32> to vector<8x32xf32>
    %cst_52 = arith.constant 5.000000e-01 : f32
    %134 = vector.broadcast %cst_52 : f32 to vector<8x32xf32>
    %135 = arith.mulf %134, %133 : vector<8x32xf32>
    %136 = math.tanh %135 : vector<8x32xf32>
    %cst_53 = arith.constant 1.000000e+00 : f32
    %137 = vector.broadcast %cst_53 : f32 to vector<8x32xf32>
    %138 = arith.addf %136, %137 : vector<8x32xf32>
    %cst_54 = arith.constant 5.000000e-01 : f32
    %139 = vector.broadcast %cst_54 : f32 to vector<8x32xf32>
    %140 = arith.mulf %139, %138 : vector<8x32xf32>
    %141 = vector.extract_strided_slice %132 {offsets = [0, 32], sizes = [8, 32], strides = [1, 1]} : vector<8x128xf32> to vector<8x32xf32>
    %cst_55 = arith.constant 5.000000e-01 : f32
    %142 = vector.broadcast %cst_55 : f32 to vector<8x32xf32>
    %143 = arith.mulf %142, %141 : vector<8x32xf32>
    %144 = math.tanh %143 : vector<8x32xf32>
    %cst_56 = arith.constant 1.000000e+00 : f32
    %145 = vector.broadcast %cst_56 : f32 to vector<8x32xf32>
    %146 = arith.addf %144, %145 : vector<8x32xf32>
    %cst_57 = arith.constant 5.000000e-01 : f32
    %147 = vector.broadcast %cst_57 : f32 to vector<8x32xf32>
    %148 = arith.mulf %147, %146 : vector<8x32xf32>
    %149 = vector.extract_strided_slice %132 {offsets = [0, 64], sizes = [8, 32], strides = [1, 1]} : vector<8x128xf32> to vector<8x32xf32>
    %150 = math.tanh %149 : vector<8x32xf32>
    %151 = vector.extract_strided_slice %132 {offsets = [0, 96], sizes = [8, 32], strides = [1, 1]} : vector<8x128xf32> to vector<8x32xf32>
    %cst_58 = arith.constant 5.000000e-01 : f32
    %152 = vector.broadcast %cst_58 : f32 to vector<8x32xf32>
    %153 = arith.mulf %152, %151 : vector<8x32xf32>
    %154 = math.tanh %153 : vector<8x32xf32>
    %cst_59 = arith.constant 1.000000e+00 : f32
    %155 = vector.broadcast %cst_59 : f32 to vector<8x32xf32>
    %156 = arith.addf %154, %155 : vector<8x32xf32>
    %cst_60 = arith.constant 5.000000e-01 : f32
    %157 = vector.broadcast %cst_60 : f32 to vector<8x32xf32>
    %158 = arith.mulf %157, %156 : vector<8x32xf32>
    %159 = arith.mulf %148, %126 : vector<8x32xf32>
    %160 = arith.mulf %140, %150 : vector<8x32xf32>
    %161 = arith.addf %159, %160 : vector<8x32xf32>
    %162 = math.tanh %161 : vector<8x32xf32>
    %163 = arith.mulf %158, %162 : vector<8x32xf32>
    %164 = arith.index_cast %1 : i32 to index
    %c0_61 = arith.constant 0 : index
    %165 = vector.load %arg5[%164, %c0_61] : memref<16x32xf32, #tpu.memory_space<vmem>>, vector<8x32xf32>
    tpu.vector_store %arg5[%164, %c0_61], %163 {strides = array<i32>} : memref<16x32xf32, #tpu.memory_space<vmem>>, vector<8x32xf32>,
    %166 = arith.index_cast %1 : i32 to index
    %c0_62 = arith.constant 0 : index
    %167 = vector.load %arg6[%166, %c0_62] : memref<16x32xf32, #tpu.memory_space<vmem>>, vector<8x32xf32>
    tpu.vector_store %arg6[%166, %c0_62], %161 {strides = array<i32>} : memref<16x32xf32, #tpu.memory_space<vmem>>, vector<8x32xf32>,
    %c0_63 = arith.constant 0 : index
    %168 = arith.index_cast %122 : i32 to index
    %c0_64 = arith.constant 0 : index
    %169 = vector.load %arg4[%c0_63, %168, %c0_64] : memref<1x64x32xf32, #tpu.memory_space<vmem>>, vector<1x8x32xf32>
    %170 = vector.shape_cast %169 : vector<1x8x32xf32> to vector<8x32xf32>
    %171 = vector.shape_cast %163 : vector<8x32xf32> to vector<1x8x32xf32>
    tpu.vector_store %arg4[%c0_63, %168, %c0_64], %171 {strides = array<i32>} : memref<1x64x32xf32, #tpu.memory_space<vmem>>, vector<1x8x32xf32>,
    %c3_i32 = arith.constant 3 : i32
    %c2_i32_65 = arith.constant 2 : i32
    %172 = arith.muli %c2_i32_65, %c3_i32 : i32
    %c7_i32_66 = arith.constant 7 : i32
    %173 = arith.subi %c7_i32_66, %172 : i32
    %174 = arith.muli %arg0, %173 : i32
    %175 = arith.addi %174, %c3_i32 : i32
    %c8_i32_67 = arith.constant 8 : i32
    %176 = arith.muli %175, %c8_i32_67 : i32
    %177 = tpu.assume_multiple %176, 8 : i32
    %178 = arith.index_cast %1 : i32 to index
    %c0_68 = arith.constant 0 : index
    %179 = vector.load %arg5[%178, %c0_68] : memref<16x32xf32, #tpu.memory_space<vmem>>, vector<8x32xf32>
    %180 = arith.index_cast %1 : i32 to index
    %c0_69 = arith.constant 0 : index
    %181 = vector.load %arg6[%180, %c0_69] : memref<16x32xf32, #tpu.memory_space<vmem>>, vector<8x32xf32>
    %c0_70 = arith.constant 0 : index
    %182 = arith.index_cast %177 : i32 to index
    %c0_71 = arith.constant 0 : index
    %183 = vector.load %arg2[%c0_70, %182, %c0_71] : memref<1x64x128xf32, #tpu.memory_space<vmem>>, vector<1x8x128xf32>
    %184 = vector.shape_cast %183 : vector<1x8x128xf32> to vector<8x128xf32>
    %185 = arith.truncf %179 : vector<8x32xf32> to vector<8x32xbf16>
    %cst_72 = arith.constant dense<0.000000e+00> : vector<8x128xf32>
    %186 = tpu.matmul %185, %6, %cst_72 {dimension_numbers = #tpu.dot_dimension_numbers<[1], [0], [0], [1], [0, 0, 1, 1], [], []>} : vector<8x32xbf16>, vector<32x128xbf16>, vector<8x128xf32> -> vector<8x128xf32>
    %187 = arith.addf %184, %186 : vector<8x128xf32>
    %188 = vector.extract_strided_slice %187 {offsets = [0, 0], sizes = [8, 32], strides = [1, 1]} : vector<8x128xf32> to vector<8x32xf32>
    %cst_73 = arith.constant 5.000000e-01 : f32
    %189 = vector.broadcast %cst_73 : f32 to vector<8x32xf32>
    %190 = arith.mulf %189, %188 : vector<8x32xf32>
    %191 = math.tanh %190 : vector<8x32xf32>
    %cst_74 = arith.constant 1.000000e+00 : f32
    %192 = vector.broadcast %cst_74 : f32 to vector<8x32xf32>
    %193 = arith.addf %191, %192 : vector<8x32xf32>
    %cst_75 = arith.constant 5.000000e-01 : f32
    %194 = vector.broadcast %cst_75 : f32 to vector<8x32xf32>
    %195 = arith.mulf %194, %193 : vector<8x32xf32>
    %196 = vector.extract_strided_slice %187 {offsets = [0, 32], sizes = [8, 32], strides = [1, 1]} : vector<8x128xf32> to vector<8x32xf32>
    %cst_76 = arith.constant 5.000000e-01 : f32
    %197 = vector.broadcast %cst_76 : f32 to vector<8x32xf32>
    %198 = arith.mulf %197, %196 : vector<8x32xf32>
    %199 = math.tanh %198 : vector<8x32xf32>
    %cst_77 = arith.constant 1.000000e+00 : f32
    %200 = vector.broadcast %cst_77 : f32 to vector<8x32xf32>
    %201 = arith.addf %199, %200 : vector<8x32xf32>
    %cst_78 = arith.constant 5.000000e-01 : f32
    %202 = vector.broadcast %cst_78 : f32 to vector<8x32xf32>
    %203 = arith.mulf %202, %201 : vector<8x32xf32>
    %204 = vector.extract_strided_slice %187 {offsets = [0, 64], sizes = [8, 32], strides = [1, 1]} : vector<8x128xf32> to vector<8x32xf32>
    %205 = math.tanh %204 : vector<8x32xf32>
    %206 = vector.extract_strided_slice %187 {offsets = [0, 96], sizes = [8, 32], strides = [1, 1]} : vector<8x128xf32> to vector<8x32xf32>
    %cst_79 = arith.constant 5.000000e-01 : f32
    %207 = vector.broadcast %cst_79 : f32 to vector<8x32xf32>
    %208 = arith.mulf %207, %206 : vector<8x32xf32>
    %209 = math.tanh %208 : vector<8x32xf32>
    %cst_80 = arith.constant 1.000000e+00 : f32
    %210 = vector.broadcast %cst_80 : f32 to vector<8x32xf32>
    %211 = arith.addf %209, %210 : vector<8x32xf32>
    %cst_81 = arith.constant 5.000000e-01 : f32
    %212 = vector.broadcast %cst_81 : f32 to vector<8x32xf32>
    %213 = arith.mulf %212, %211 : vector<8x32xf32>
    %214 = arith.mulf %203, %181 : vector<8x32xf32>
    %215 = arith.mulf %195, %205 : vector<8x32xf32>
    %216 = arith.addf %214, %215 : vector<8x32xf32>
    %217 = math.tanh %216 : vector<8x32xf32>
    %218 = arith.mulf %213, %217 : vector<8x32xf32>
    %219 = arith.index_cast %1 : i32 to index
    %c0_82 = arith.constant 0 : index
    %220 = vector.load %arg5[%219, %c0_82] : memref<16x32xf32, #tpu.memory_space<vmem>>, vector<8x32xf32>
    tpu.vector_store %arg5[%219, %c0_82], %218 {strides = array<i32>} : memref<16x32xf32, #tpu.memory_space<vmem>>, vector<8x32xf32>,
    %221 = arith.index_cast %1 : i32 to index
    %c0_83 = arith.constant 0 : index
    %222 = vector.load %arg6[%221, %c0_83] : memref<16x32xf32, #tpu.memory_space<vmem>>, vector<8x32xf32>
    tpu.vector_store %arg6[%221, %c0_83], %216 {strides = array<i32>} : memref<16x32xf32, #tpu.memory_space<vmem>>, vector<8x32xf32>,
    %c0_84 = arith.constant 0 : index
    %223 = arith.index_cast %177 : i32 to index
    %c0_85 = arith.constant 0 : index
    %224 = vector.load %arg4[%c0_84, %223, %c0_85] : memref<1x64x32xf32, #tpu.memory_space<vmem>>, vector<1x8x32xf32>
    %225 = vector.shape_cast %224 : vector<1x8x32xf32> to vector<8x32xf32>
    %226 = vector.shape_cast %218 : vector<8x32xf32> to vector<1x8x32xf32>
    tpu.vector_store %arg4[%c0_84, %223, %c0_85], %226 {strides = array<i32>} : memref<1x64x32xf32, #tpu.memory_space<vmem>>, vector<1x8x32xf32>,
    %c4_i32 = arith.constant 4 : i32
    %c2_i32_86 = arith.constant 2 : i32
    %227 = arith.muli %c2_i32_86, %c4_i32 : i32
    %c7_i32_87 = arith.constant 7 : i32
    %228 = arith.subi %c7_i32_87, %227 : i32
    %229 = arith.muli %arg0, %228 : i32
    %230 = arith.addi %229, %c4_i32 : i32
    %c8_i32_88 = arith.constant 8 : i32
    %231 = arith.muli %230, %c8_i32_88 : i32
    %232 = tpu.assume_multiple %231, 8 : i32
    %233 = arith.index_cast %1 : i32 to index
    %c0_89 = arith.constant 0 : index
    %234 = vector.load %arg5[%233, %c0_89] : memref<16x32xf32, #tpu.memory_space<vmem>>, vector<8x32xf32>
    %235 = arith.index_cast %1 : i32 to index
    %c0_90 = arith.constant 0 : index
    %236 = vector.load %arg6[%235, %c0_90] : memref<16x32xf32, #tpu.memory_space<vmem>>, vector<8x32xf32>
    %c0_91 = arith.constant 0 : index
    %237 = arith.index_cast %232 : i32 to index
    %c0_92 = arith.constant 0 : index
    %238 = vector.load %arg2[%c0_91, %237, %c0_92] : memref<1x64x128xf32, #tpu.memory_space<vmem>>, vector<1x8x128xf32>
    %239 = vector.shape_cast %238 : vector<1x8x128xf32> to vector<8x128xf32>
    %240 = arith.truncf %234 : vector<8x32xf32> to vector<8x32xbf16>
    %cst_93 = arith.constant dense<0.000000e+00> : vector<8x128xf32>
    %241 = tpu.matmul %240, %6, %cst_93 {dimension_numbers = #tpu.dot_dimension_numbers<[1], [0], [0], [1], [0, 0, 1, 1], [], []>} : vector<8x32xbf16>, vector<32x128xbf16>, vector<8x128xf32> -> vector<8x128xf32>
    %242 = arith.addf %239, %241 : vector<8x128xf32>
    %243 = vector.extract_strided_slice %242 {offsets = [0, 0], sizes = [8, 32], strides = [1, 1]} : vector<8x128xf32> to vector<8x32xf32>
    %cst_94 = arith.constant 5.000000e-01 : f32
    %244 = vector.broadcast %cst_94 : f32 to vector<8x32xf32>
    %245 = arith.mulf %244, %243 : vector<8x32xf32>
    %246 = math.tanh %245 : vector<8x32xf32>
    %cst_95 = arith.constant 1.000000e+00 : f32
    %247 = vector.broadcast %cst_95 : f32 to vector<8x32xf32>
    %248 = arith.addf %246, %247 : vector<8x32xf32>
    %cst_96 = arith.constant 5.000000e-01 : f32
    %249 = vector.broadcast %cst_96 : f32 to vector<8x32xf32>
    %250 = arith.mulf %249, %248 : vector<8x32xf32>
    %251 = vector.extract_strided_slice %242 {offsets = [0, 32], sizes = [8, 32], strides = [1, 1]} : vector<8x128xf32> to vector<8x32xf32>
    %cst_97 = arith.constant 5.000000e-01 : f32
    %252 = vector.broadcast %cst_97 : f32 to vector<8x32xf32>
    %253 = arith.mulf %252, %251 : vector<8x32xf32>
    %254 = math.tanh %253 : vector<8x32xf32>
    %cst_98 = arith.constant 1.000000e+00 : f32
    %255 = vector.broadcast %cst_98 : f32 to vector<8x32xf32>
    %256 = arith.addf %254, %255 : vector<8x32xf32>
    %cst_99 = arith.constant 5.000000e-01 : f32
    %257 = vector.broadcast %cst_99 : f32 to vector<8x32xf32>
    %258 = arith.mulf %257, %256 : vector<8x32xf32>
    %259 = vector.extract_strided_slice %242 {offsets = [0, 64], sizes = [8, 32], strides = [1, 1]} : vector<8x128xf32> to vector<8x32xf32>
    %260 = math.tanh %259 : vector<8x32xf32>
    %261 = vector.extract_strided_slice %242 {offsets = [0, 96], sizes = [8, 32], strides = [1, 1]} : vector<8x128xf32> to vector<8x32xf32>
    %cst_100 = arith.constant 5.000000e-01 : f32
    %262 = vector.broadcast %cst_100 : f32 to vector<8x32xf32>
    %263 = arith.mulf %262, %261 : vector<8x32xf32>
    %264 = math.tanh %263 : vector<8x32xf32>
    %cst_101 = arith.constant 1.000000e+00 : f32
    %265 = vector.broadcast %cst_101 : f32 to vector<8x32xf32>
    %266 = arith.addf %264, %265 : vector<8x32xf32>
    %cst_102 = arith.constant 5.000000e-01 : f32
    %267 = vector.broadcast %cst_102 : f32 to vector<8x32xf32>
    %268 = arith.mulf %267, %266 : vector<8x32xf32>
    %269 = arith.mulf %258, %236 : vector<8x32xf32>
    %270 = arith.mulf %250, %260 : vector<8x32xf32>
    %271 = arith.addf %269, %270 : vector<8x32xf32>
    %272 = math.tanh %271 : vector<8x32xf32>
    %273 = arith.mulf %268, %272 : vector<8x32xf32>
    %274 = arith.index_cast %1 : i32 to index
    %c0_103 = arith.constant 0 : index
    %275 = vector.load %arg5[%274, %c0_103] : memref<16x32xf32, #tpu.memory_space<vmem>>, vector<8x32xf32>
    tpu.vector_store %arg5[%274, %c0_103], %273 {strides = array<i32>} : memref<16x32xf32, #tpu.memory_space<vmem>>, vector<8x32xf32>,
    %276 = arith.index_cast %1 : i32 to index
    %c0_104 = arith.constant 0 : index
    %277 = vector.load %arg6[%276, %c0_104] : memref<16x32xf32, #tpu.memory_space<vmem>>, vector<8x32xf32>
    tpu.vector_store %arg6[%276, %c0_104], %271 {strides = array<i32>} : memref<16x32xf32, #tpu.memory_space<vmem>>, vector<8x32xf32>,
    %c0_105 = arith.constant 0 : index
    %278 = arith.index_cast %232 : i32 to index
    %c0_106 = arith.constant 0 : index
    %279 = vector.load %arg4[%c0_105, %278, %c0_106] : memref<1x64x32xf32, #tpu.memory_space<vmem>>, vector<1x8x32xf32>
    %280 = vector.shape_cast %279 : vector<1x8x32xf32> to vector<8x32xf32>
    %281 = vector.shape_cast %273 : vector<8x32xf32> to vector<1x8x32xf32>
    tpu.vector_store %arg4[%c0_105, %278, %c0_106], %281 {strides = array<i32>} : memref<1x64x32xf32, #tpu.memory_space<vmem>>, vector<1x8x32xf32>,
    %c5_i32 = arith.constant 5 : i32
    %c2_i32_107 = arith.constant 2 : i32
    %282 = arith.muli %c2_i32_107, %c5_i32 : i32
    %c7_i32_108 = arith.constant 7 : i32
    %283 = arith.subi %c7_i32_108, %282 : i32
    %284 = arith.muli %arg0, %283 : i32
    %285 = arith.addi %284, %c5_i32 : i32
    %c8_i32_109 = arith.constant 8 : i32
    %286 = arith.muli %285, %c8_i32_109 : i32
    %287 = tpu.assume_multiple %286, 8 : i32
    %288 = arith.index_cast %1 : i32 to index
    %c0_110 = arith.constant 0 : index
    %289 = vector.load %arg5[%288, %c0_110] : memref<16x32xf32, #tpu.memory_space<vmem>>, vector<8x32xf32>
    %290 = arith.index_cast %1 : i32 to index
    %c0_111 = arith.constant 0 : index
    %291 = vector.load %arg6[%290, %c0_111] : memref<16x32xf32, #tpu.memory_space<vmem>>, vector<8x32xf32>
    %c0_112 = arith.constant 0 : index
    %292 = arith.index_cast %287 : i32 to index
    %c0_113 = arith.constant 0 : index
    %293 = vector.load %arg2[%c0_112, %292, %c0_113] : memref<1x64x128xf32, #tpu.memory_space<vmem>>, vector<1x8x128xf32>
    %294 = vector.shape_cast %293 : vector<1x8x128xf32> to vector<8x128xf32>
    %295 = arith.truncf %289 : vector<8x32xf32> to vector<8x32xbf16>
    %cst_114 = arith.constant dense<0.000000e+00> : vector<8x128xf32>
    %296 = tpu.matmul %295, %6, %cst_114 {dimension_numbers = #tpu.dot_dimension_numbers<[1], [0], [0], [1], [0, 0, 1, 1], [], []>} : vector<8x32xbf16>, vector<32x128xbf16>, vector<8x128xf32> -> vector<8x128xf32>
    %297 = arith.addf %294, %296 : vector<8x128xf32>
    %298 = vector.extract_strided_slice %297 {offsets = [0, 0], sizes = [8, 32], strides = [1, 1]} : vector<8x128xf32> to vector<8x32xf32>
    %cst_115 = arith.constant 5.000000e-01 : f32
    %299 = vector.broadcast %cst_115 : f32 to vector<8x32xf32>
    %300 = arith.mulf %299, %298 : vector<8x32xf32>
    %301 = math.tanh %300 : vector<8x32xf32>
    %cst_116 = arith.constant 1.000000e+00 : f32
    %302 = vector.broadcast %cst_116 : f32 to vector<8x32xf32>
    %303 = arith.addf %301, %302 : vector<8x32xf32>
    %cst_117 = arith.constant 5.000000e-01 : f32
    %304 = vector.broadcast %cst_117 : f32 to vector<8x32xf32>
    %305 = arith.mulf %304, %303 : vector<8x32xf32>
    %306 = vector.extract_strided_slice %297 {offsets = [0, 32], sizes = [8, 32], strides = [1, 1]} : vector<8x128xf32> to vector<8x32xf32>
    %cst_118 = arith.constant 5.000000e-01 : f32
    %307 = vector.broadcast %cst_118 : f32 to vector<8x32xf32>
    %308 = arith.mulf %307, %306 : vector<8x32xf32>
    %309 = math.tanh %308 : vector<8x32xf32>
    %cst_119 = arith.constant 1.000000e+00 : f32
    %310 = vector.broadcast %cst_119 : f32 to vector<8x32xf32>
    %311 = arith.addf %309, %310 : vector<8x32xf32>
    %cst_120 = arith.constant 5.000000e-01 : f32
    %312 = vector.broadcast %cst_120 : f32 to vector<8x32xf32>
    %313 = arith.mulf %312, %311 : vector<8x32xf32>
    %314 = vector.extract_strided_slice %297 {offsets = [0, 64], sizes = [8, 32], strides = [1, 1]} : vector<8x128xf32> to vector<8x32xf32>
    %315 = math.tanh %314 : vector<8x32xf32>
    %316 = vector.extract_strided_slice %297 {offsets = [0, 96], sizes = [8, 32], strides = [1, 1]} : vector<8x128xf32> to vector<8x32xf32>
    %cst_121 = arith.constant 5.000000e-01 : f32
    %317 = vector.broadcast %cst_121 : f32 to vector<8x32xf32>
    %318 = arith.mulf %317, %316 : vector<8x32xf32>
    %319 = math.tanh %318 : vector<8x32xf32>
    %cst_122 = arith.constant 1.000000e+00 : f32
    %320 = vector.broadcast %cst_122 : f32 to vector<8x32xf32>
    %321 = arith.addf %319, %320 : vector<8x32xf32>
    %cst_123 = arith.constant 5.000000e-01 : f32
    %322 = vector.broadcast %cst_123 : f32 to vector<8x32xf32>
    %323 = arith.mulf %322, %321 : vector<8x32xf32>
    %324 = arith.mulf %313, %291 : vector<8x32xf32>
    %325 = arith.mulf %305, %315 : vector<8x32xf32>
    %326 = arith.addf %324, %325 : vector<8x32xf32>
    %327 = math.tanh %326 : vector<8x32xf32>
    %328 = arith.mulf %323, %327 : vector<8x32xf32>
    %329 = arith.index_cast %1 : i32 to index
    %c0_124 = arith.constant 0 : index
    %330 = vector.load %arg5[%329, %c0_124] : memref<16x32xf32, #tpu.memory_space<vmem>>, vector<8x32xf32>
    tpu.vector_store %arg5[%329, %c0_124], %328 {strides = array<i32>} : memref<16x32xf32, #tpu.memory_space<vmem>>, vector<8x32xf32>,
    %331 = arith.index_cast %1 : i32 to index
    %c0_125 = arith.constant 0 : index
    %332 = vector.load %arg6[%331, %c0_125] : memref<16x32xf32, #tpu.memory_space<vmem>>, vector<8x32xf32>
    tpu.vector_store %arg6[%331, %c0_125], %326 {strides = array<i32>} : memref<16x32xf32, #tpu.memory_space<vmem>>, vector<8x32xf32>,
    %c0_126 = arith.constant 0 : index
    %333 = arith.index_cast %287 : i32 to index
    %c0_127 = arith.constant 0 : index
    %334 = vector.load %arg4[%c0_126, %333, %c0_127] : memref<1x64x32xf32, #tpu.memory_space<vmem>>, vector<1x8x32xf32>
    %335 = vector.shape_cast %334 : vector<1x8x32xf32> to vector<8x32xf32>
    %336 = vector.shape_cast %328 : vector<8x32xf32> to vector<1x8x32xf32>
    tpu.vector_store %arg4[%c0_126, %333, %c0_127], %336 {strides = array<i32>} : memref<1x64x32xf32, #tpu.memory_space<vmem>>, vector<1x8x32xf32>,
    %c6_i32 = arith.constant 6 : i32
    %c2_i32_128 = arith.constant 2 : i32
    %337 = arith.muli %c2_i32_128, %c6_i32 : i32
    %c7_i32_129 = arith.constant 7 : i32
    %338 = arith.subi %c7_i32_129, %337 : i32
    %339 = arith.muli %arg0, %338 : i32
    %340 = arith.addi %339, %c6_i32 : i32
    %c8_i32_130 = arith.constant 8 : i32
    %341 = arith.muli %340, %c8_i32_130 : i32
    %342 = tpu.assume_multiple %341, 8 : i32
    %343 = arith.index_cast %1 : i32 to index
    %c0_131 = arith.constant 0 : index
    %344 = vector.load %arg5[%343, %c0_131] : memref<16x32xf32, #tpu.memory_space<vmem>>, vector<8x32xf32>
    %345 = arith.index_cast %1 : i32 to index
    %c0_132 = arith.constant 0 : index
    %346 = vector.load %arg6[%345, %c0_132] : memref<16x32xf32, #tpu.memory_space<vmem>>, vector<8x32xf32>
    %c0_133 = arith.constant 0 : index
    %347 = arith.index_cast %342 : i32 to index
    %c0_134 = arith.constant 0 : index
    %348 = vector.load %arg2[%c0_133, %347, %c0_134] : memref<1x64x128xf32, #tpu.memory_space<vmem>>, vector<1x8x128xf32>
    %349 = vector.shape_cast %348 : vector<1x8x128xf32> to vector<8x128xf32>
    %350 = arith.truncf %344 : vector<8x32xf32> to vector<8x32xbf16>
    %cst_135 = arith.constant dense<0.000000e+00> : vector<8x128xf32>
    %351 = tpu.matmul %350, %6, %cst_135 {dimension_numbers = #tpu.dot_dimension_numbers<[1], [0], [0], [1], [0, 0, 1, 1], [], []>} : vector<8x32xbf16>, vector<32x128xbf16>, vector<8x128xf32> -> vector<8x128xf32>
    %352 = arith.addf %349, %351 : vector<8x128xf32>
    %353 = vector.extract_strided_slice %352 {offsets = [0, 0], sizes = [8, 32], strides = [1, 1]} : vector<8x128xf32> to vector<8x32xf32>
    %cst_136 = arith.constant 5.000000e-01 : f32
    %354 = vector.broadcast %cst_136 : f32 to vector<8x32xf32>
    %355 = arith.mulf %354, %353 : vector<8x32xf32>
    %356 = math.tanh %355 : vector<8x32xf32>
    %cst_137 = arith.constant 1.000000e+00 : f32
    %357 = vector.broadcast %cst_137 : f32 to vector<8x32xf32>
    %358 = arith.addf %356, %357 : vector<8x32xf32>
    %cst_138 = arith.constant 5.000000e-01 : f32
    %359 = vector.broadcast %cst_138 : f32 to vector<8x32xf32>
    %360 = arith.mulf %359, %358 : vector<8x32xf32>
    %361 = vector.extract_strided_slice %352 {offsets = [0, 32], sizes = [8, 32], strides = [1, 1]} : vector<8x128xf32> to vector<8x32xf32>
    %cst_139 = arith.constant 5.000000e-01 : f32
    %362 = vector.broadcast %cst_139 : f32 to vector<8x32xf32>
    %363 = arith.mulf %362, %361 : vector<8x32xf32>
    %364 = math.tanh %363 : vector<8x32xf32>
    %cst_140 = arith.constant 1.000000e+00 : f32
    %365 = vector.broadcast %cst_140 : f32 to vector<8x32xf32>
    %366 = arith.addf %364, %365 : vector<8x32xf32>
    %cst_141 = arith.constant 5.000000e-01 : f32
    %367 = vector.broadcast %cst_141 : f32 to vector<8x32xf32>
    %368 = arith.mulf %367, %366 : vector<8x32xf32>
    %369 = vector.extract_strided_slice %352 {offsets = [0, 64], sizes = [8, 32], strides = [1, 1]} : vector<8x128xf32> to vector<8x32xf32>
    %370 = math.tanh %369 : vector<8x32xf32>
    %371 = vector.extract_strided_slice %352 {offsets = [0, 96], sizes = [8, 32], strides = [1, 1]} : vector<8x128xf32> to vector<8x32xf32>
    %cst_142 = arith.constant 5.000000e-01 : f32
    %372 = vector.broadcast %cst_142 : f32 to vector<8x32xf32>
    %373 = arith.mulf %372, %371 : vector<8x32xf32>
    %374 = math.tanh %373 : vector<8x32xf32>
    %cst_143 = arith.constant 1.000000e+00 : f32
    %375 = vector.broadcast %cst_143 : f32 to vector<8x32xf32>
    %376 = arith.addf %374, %375 : vector<8x32xf32>
    %cst_144 = arith.constant 5.000000e-01 : f32
    %377 = vector.broadcast %cst_144 : f32 to vector<8x32xf32>
    %378 = arith.mulf %377, %376 : vector<8x32xf32>
    %379 = arith.mulf %368, %346 : vector<8x32xf32>
    %380 = arith.mulf %360, %370 : vector<8x32xf32>
    %381 = arith.addf %379, %380 : vector<8x32xf32>
    %382 = math.tanh %381 : vector<8x32xf32>
    %383 = arith.mulf %378, %382 : vector<8x32xf32>
    %384 = arith.index_cast %1 : i32 to index
    %c0_145 = arith.constant 0 : index
    %385 = vector.load %arg5[%384, %c0_145] : memref<16x32xf32, #tpu.memory_space<vmem>>, vector<8x32xf32>
    tpu.vector_store %arg5[%384, %c0_145], %383 {strides = array<i32>} : memref<16x32xf32, #tpu.memory_space<vmem>>, vector<8x32xf32>,
    %386 = arith.index_cast %1 : i32 to index
    %c0_146 = arith.constant 0 : index
    %387 = vector.load %arg6[%386, %c0_146] : memref<16x32xf32, #tpu.memory_space<vmem>>, vector<8x32xf32>
    tpu.vector_store %arg6[%386, %c0_146], %381 {strides = array<i32>} : memref<16x32xf32, #tpu.memory_space<vmem>>, vector<8x32xf32>,
    %c0_147 = arith.constant 0 : index
    %388 = arith.index_cast %342 : i32 to index
    %c0_148 = arith.constant 0 : index
    %389 = vector.load %arg4[%c0_147, %388, %c0_148] : memref<1x64x32xf32, #tpu.memory_space<vmem>>, vector<1x8x32xf32>
    %390 = vector.shape_cast %389 : vector<1x8x32xf32> to vector<8x32xf32>
    %391 = vector.shape_cast %383 : vector<8x32xf32> to vector<1x8x32xf32>
    tpu.vector_store %arg4[%c0_147, %388, %c0_148], %391 {strides = array<i32>} : memref<1x64x32xf32, #tpu.memory_space<vmem>>, vector<1x8x32xf32>,
    %c7_i32_149 = arith.constant 7 : i32
    %c2_i32_150 = arith.constant 2 : i32
    %392 = arith.muli %c2_i32_150, %c7_i32_149 : i32
    %c7_i32_151 = arith.constant 7 : i32
    %393 = arith.subi %c7_i32_151, %392 : i32
    %394 = arith.muli %arg0, %393 : i32
    %395 = arith.addi %394, %c7_i32_149 : i32
    %c8_i32_152 = arith.constant 8 : i32
    %396 = arith.muli %395, %c8_i32_152 : i32
    %397 = tpu.assume_multiple %396, 8 : i32
    %398 = arith.index_cast %1 : i32 to index
    %c0_153 = arith.constant 0 : index
    %399 = vector.load %arg5[%398, %c0_153] : memref<16x32xf32, #tpu.memory_space<vmem>>, vector<8x32xf32>
    %400 = arith.index_cast %1 : i32 to index
    %c0_154 = arith.constant 0 : index
    %401 = vector.load %arg6[%400, %c0_154] : memref<16x32xf32, #tpu.memory_space<vmem>>, vector<8x32xf32>
    %c0_155 = arith.constant 0 : index
    %402 = arith.index_cast %397 : i32 to index
    %c0_156 = arith.constant 0 : index
    %403 = vector.load %arg2[%c0_155, %402, %c0_156] : memref<1x64x128xf32, #tpu.memory_space<vmem>>, vector<1x8x128xf32>
    %404 = vector.shape_cast %403 : vector<1x8x128xf32> to vector<8x128xf32>
    %405 = arith.truncf %399 : vector<8x32xf32> to vector<8x32xbf16>
    %cst_157 = arith.constant dense<0.000000e+00> : vector<8x128xf32>
    %406 = tpu.matmul %405, %6, %cst_157 {dimension_numbers = #tpu.dot_dimension_numbers<[1], [0], [0], [1], [0, 0, 1, 1], [], []>} : vector<8x32xbf16>, vector<32x128xbf16>, vector<8x128xf32> -> vector<8x128xf32>
    %407 = arith.addf %404, %406 : vector<8x128xf32>
    %408 = vector.extract_strided_slice %407 {offsets = [0, 0], sizes = [8, 32], strides = [1, 1]} : vector<8x128xf32> to vector<8x32xf32>
    %cst_158 = arith.constant 5.000000e-01 : f32
    %409 = vector.broadcast %cst_158 : f32 to vector<8x32xf32>
    %410 = arith.mulf %409, %408 : vector<8x32xf32>
    %411 = math.tanh %410 : vector<8x32xf32>
    %cst_159 = arith.constant 1.000000e+00 : f32
    %412 = vector.broadcast %cst_159 : f32 to vector<8x32xf32>
    %413 = arith.addf %411, %412 : vector<8x32xf32>
    %cst_160 = arith.constant 5.000000e-01 : f32
    %414 = vector.broadcast %cst_160 : f32 to vector<8x32xf32>
    %415 = arith.mulf %414, %413 : vector<8x32xf32>
    %416 = vector.extract_strided_slice %407 {offsets = [0, 32], sizes = [8, 32], strides = [1, 1]} : vector<8x128xf32> to vector<8x32xf32>
    %cst_161 = arith.constant 5.000000e-01 : f32
    %417 = vector.broadcast %cst_161 : f32 to vector<8x32xf32>
    %418 = arith.mulf %417, %416 : vector<8x32xf32>
    %419 = math.tanh %418 : vector<8x32xf32>
    %cst_162 = arith.constant 1.000000e+00 : f32
    %420 = vector.broadcast %cst_162 : f32 to vector<8x32xf32>
    %421 = arith.addf %419, %420 : vector<8x32xf32>
    %cst_163 = arith.constant 5.000000e-01 : f32
    %422 = vector.broadcast %cst_163 : f32 to vector<8x32xf32>
    %423 = arith.mulf %422, %421 : vector<8x32xf32>
    %424 = vector.extract_strided_slice %407 {offsets = [0, 64], sizes = [8, 32], strides = [1, 1]} : vector<8x128xf32> to vector<8x32xf32>
    %425 = math.tanh %424 : vector<8x32xf32>
    %426 = vector.extract_strided_slice %407 {offsets = [0, 96], sizes = [8, 32], strides = [1, 1]} : vector<8x128xf32> to vector<8x32xf32>
    %cst_164 = arith.constant 5.000000e-01 : f32
    %427 = vector.broadcast %cst_164 : f32 to vector<8x32xf32>
    %428 = arith.mulf %427, %426 : vector<8x32xf32>
    %429 = math.tanh %428 : vector<8x32xf32>
    %cst_165 = arith.constant 1.000000e+00 : f32
    %430 = vector.broadcast %cst_165 : f32 to vector<8x32xf32>
    %431 = arith.addf %429, %430 : vector<8x32xf32>
    %cst_166 = arith.constant 5.000000e-01 : f32
    %432 = vector.broadcast %cst_166 : f32 to vector<8x32xf32>
    %433 = arith.mulf %432, %431 : vector<8x32xf32>
    %434 = arith.mulf %423, %401 : vector<8x32xf32>
    %435 = arith.mulf %415, %425 : vector<8x32xf32>
    %436 = arith.addf %434, %435 : vector<8x32xf32>
    %437 = math.tanh %436 : vector<8x32xf32>
    %438 = arith.mulf %433, %437 : vector<8x32xf32>
    %439 = arith.index_cast %1 : i32 to index
    %c0_167 = arith.constant 0 : index
    %440 = vector.load %arg5[%439, %c0_167] : memref<16x32xf32, #tpu.memory_space<vmem>>, vector<8x32xf32>
    tpu.vector_store %arg5[%439, %c0_167], %438 {strides = array<i32>} : memref<16x32xf32, #tpu.memory_space<vmem>>, vector<8x32xf32>,
    %441 = arith.index_cast %1 : i32 to index
    %c0_168 = arith.constant 0 : index
    %442 = vector.load %arg6[%441, %c0_168] : memref<16x32xf32, #tpu.memory_space<vmem>>, vector<8x32xf32>
    tpu.vector_store %arg6[%441, %c0_168], %436 {strides = array<i32>} : memref<16x32xf32, #tpu.memory_space<vmem>>, vector<8x32xf32>,
    %c0_169 = arith.constant 0 : index
    %443 = arith.index_cast %397 : i32 to index
    %c0_170 = arith.constant 0 : index
    %444 = vector.load %arg4[%c0_169, %443, %c0_170] : memref<1x64x32xf32, #tpu.memory_space<vmem>>, vector<1x8x32xf32>
    %445 = vector.shape_cast %444 : vector<1x8x32xf32> to vector<8x32xf32>
    %446 = vector.shape_cast %438 : vector<8x32xf32> to vector<1x8x32xf32>
    tpu.vector_store %arg4[%c0_169, %443, %c0_170], %446 {strides = array<i32>} : memref<1x64x32xf32, #tpu.memory_space<vmem>>, vector<1x8x32xf32>,
    %c8_i32_171 = arith.constant 8 : i32
    return
  }
  func.func @transform_0(%arg0: i32, %arg1: i32) -> (i32, i32, i32) {
    %c2_i32 = arith.constant 2 : i32
    %0 = arith.muli %c2_i32, %arg1 : i32
    %c0_i32 = arith.constant 0 : i32
    %1 = arith.subi %c0_i32, %0 : i32
    %2 = arith.muli %arg0, %1 : i32
    %3 = arith.addi %2, %arg1 : i32
    %c0_i32_0 = arith.constant 0 : i32
    %c0_i32_1 = arith.constant 0 : i32
    return %arg0, %3, %c0_i32_0 : i32, i32, i32
  }
  func.func @transform_1(%arg0: i32, %arg1: i32) -> (i32, i32, i32) {
    %c0_i32 = arith.constant 0 : i32
    %c0_i32_0 = arith.constant 0 : i32
    %c0_i32_1 = arith.constant 0 : i32
    return %arg0, %c0_i32, %c0_i32_0 : i32, i32, i32
  }
  func.func @transform_2(%arg0: i32, %arg1: i32) -> (i32, i32, i32) {
    %c2_i32 = arith.constant 2 : i32
    %0 = arith.muli %c2_i32, %arg1 : i32
    %c0_i32 = arith.constant 0 : i32
    %1 = arith.subi %c0_i32, %0 : i32
    %2 = arith.muli %arg0, %1 : i32
    %3 = arith.addi %2, %arg1 : i32
    %c0_i32_0 = arith.constant 0 : i32
    %c0_i32_1 = arith.constant 0 : i32
    return %arg0, %3, %c0_i32_0 : i32, i32, i32
  }
}

module attributes {stable_mosaic.version = 11 : i64} {
  func.func @_gx_matmul_kernel(%arg0: i32, %arg1: i32, %arg2: memref<64x64xf32, #tpu.memory_space<vmem>>, %arg3: memref<1x64x128xbf16, #tpu.memory_space<vmem>>, %arg4: memref<1x1x128xf32, #tpu.memory_space<vmem>>, %arg5: memref<1x64x128xf32, #tpu.memory_space<vmem>>) attributes {dimension_semantics = [#tpu.dimension_semantics<parallel>, #tpu.dimension_semantics<parallel>], iteration_bounds = array<i64: 2, 1>, scalar_prefetch = 0 : i64, scratch_operands = 0 : i64, tpu.core_type = #tpu.core_type<tc>, window_params = [{transform_indices = @transform_0, window_bounds = array<i64: 64, 64>}, {transform_indices = @transform_1, window_bounds = array<i64: 1, 64, 128>}, {transform_indices = @transform_2, window_bounds = array<i64: 1, 1, 128>}, {transform_indices = @transform_3, window_bounds = array<i64: 1, 64, 128>}]} {
    %c0 = arith.constant 0 : index
    %c0_0 = arith.constant 0 : index
    %0 = vector.load %arg2[%c0, %c0_0] : memref<64x64xf32, #tpu.memory_space<vmem>>, vector<64x64xf32>
    %1 = arith.truncf %0 : vector<64x64xf32> to vector<64x64xbf16>
    %c0_1 = arith.constant 0 : index
    %c0_2 = arith.constant 0 : index
    %c0_3 = arith.constant 0 : index
    %2 = vector.load %arg3[%c0_1, %c0_2, %c0_3] : memref<1x64x128xbf16, #tpu.memory_space<vmem>>, vector<1x64x128xbf16>
    %3 = vector.shape_cast %2 : vector<1x64x128xbf16> to vector<64x128xbf16>
    %cst = arith.constant dense<0.000000e+00> : vector<64x128xf32>
    %4 = tpu.matmul %1, %3, %cst {dimension_numbers = #tpu.dot_dimension_numbers<[1], [0], [0], [1], [0, 0, 1, 1], [], []>} : vector<64x64xbf16>, vector<64x128xbf16>, vector<64x128xf32> -> vector<64x128xf32>
    %c0_4 = arith.constant 0 : index
    %c0_5 = arith.constant 0 : index
    %c0_6 = arith.constant 0 : index
    %5 = vector.load %arg4[%c0_4, %c0_5, %c0_6] : memref<1x1x128xf32, #tpu.memory_space<vmem>>, vector<1x1x128xf32>
    %6 = vector.shape_cast %5 : vector<1x1x128xf32> to vector<1x128xf32>
    %7 = vector.broadcast %6 : vector<1x128xf32> to vector<64x128xf32>
    %8 = arith.addf %4, %7 : vector<64x128xf32>
    %c0_7 = arith.constant 0 : index
    %c0_8 = arith.constant 0 : index
    %c0_9 = arith.constant 0 : index
    %9 = vector.load %arg5[%c0_7, %c0_8, %c0_9] : memref<1x64x128xf32, #tpu.memory_space<vmem>>, vector<1x64x128xf32>
    %10 = vector.shape_cast %9 : vector<1x64x128xf32> to vector<64x128xf32>
    %11 = vector.shape_cast %8 : vector<64x128xf32> to vector<1x64x128xf32>
    tpu.vector_store %arg5[%c0_7, %c0_8, %c0_9], %11 {strides = array<i32>} : memref<1x64x128xf32, #tpu.memory_space<vmem>>, vector<1x64x128xf32>,
    return
  }
  func.func @transform_0(%arg0: i32, %arg1: i32) -> (i32, i32) {
    %c0_i32 = arith.constant 0 : i32
    %c0_i32_0 = arith.constant 0 : i32
    return %arg1, %c0_i32 : i32, i32
  }
  func.func @transform_1(%arg0: i32, %arg1: i32) -> (i32, i32, i32) {
    %c0_i32 = arith.constant 0 : i32
    %c0_i32_0 = arith.constant 0 : i32
    %c0_i32_1 = arith.constant 0 : i32
    return %arg0, %c0_i32, %c0_i32_0 : i32, i32, i32
  }
  func.func @transform_2(%arg0: i32, %arg1: i32) -> (i32, i32, i32) {
    %c0_i32 = arith.constant 0 : i32
    %c0_i32_0 = arith.constant 0 : i32
    %c0_i32_1 = arith.constant 0 : i32
    return %arg0, %c0_i32, %c0_i32_0 : i32, i32, i32
  }
  func.func @transform_3(%arg0: i32, %arg1: i32) -> (i32, i32, i32) {
    %c0_i32 = arith.constant 0 : i32
    %c0_i32_0 = arith.constant 0 : i32
    return %arg0, %arg1, %c0_i32 : i32, i32, i32
  }
}

</mosaic_0001>

<bundles_post_ra>
// kernel: lstm_module_forward.6
= control target key start
LH: loop header
LB: loop body
LE: loop exit
PB: predicated region body
PF: predicated region fallthrough
CT: control target
= control target key end

     0   :  { %s555_s12 = smov 0   ;;  %s557_s13 = smov 0   ;;  %s619_s0 = inlined_call_operand.vmem [shape: f32[64,16], index: 0, kind: input, shape index: {}]   ;;  %s620_s1 = inlined_call_operand.vmem [shape: bf16[2,16,128], index: 1, kind: input, shape index: {}]   ;;  %s621_s2 = inlined_call_operand.vmem [shape: f32[2,1,128], index: 2, kind: input, shape index: {}]   ;;  %s622_s3 = inlined_call_operand.vmem [shape: f32[2,64,128], index: 3, kind: output, shape index: {}]  }
   0x1   :  { %s559_s14 = smov 0  }
   0x2 LB: > { %s25_s15 = sadd.s32 1, %s529_s13  ;;  %p454_p0 = scmp.ge.s32.totalorder %s533_s14, 1  ;;  %s533_s14 = sphi %s559_s14, %s13_s14   ;;  %s529_s13 = sphi %s557_s13, %s624_s13   ;;  %s525_s12 = sphi %s555_s12, %s623_s12  }
   0x3   : > { %p27_p1 = scmp.ge.s32.totalorder %s25_s15, 2  ;;  %p170_p2 = scmp.lt.s32.totalorder %s533_s14, 3 }
   0x5   : > { %s626_s15 = smov (%p27_p1, %s25_s15), 0  ;;  %p171_p3 = pnand %p454_p0, %p170_p2 }
   0x6   : > { %p212_p4 = scmp.lt.s32.totalorder (!%p171_p3), %s525_s12, 1  ;;  %v231_v0 = vld [vmem:[%s619_s0] sm:$0xff] (!%p171_p3)  ;;  %v232_v1 = vld [vmem:[%s619_s0 + $0x8] sm:$0xff] (!%p171_p3)  ;;  %vm258_vm0 = vcmask (!%p171_p3), 130048   ;;  %v233_v6 = vld [vmem:[%s619_s0 + $0x10] sm:$0xff] (!%p171_p3) }
   0x7   : > { %174 = sbr.rel (%p171_p3) target bundleno = 240 (0xf0), region = 32  ;;  %v235_v2 = vld [vmem:[%s619_s0 + $0x20] sm:$0xff] (!%p171_p3)  ;;  %v239_v3 = vpack.c.bf16 (!%p171_p3), %v232_v1, %v231_v0  ;;  %v236_v4 = vld [vmem:[%s619_s0 + $0x28] sm:$0xff] (!%p171_p3)  ;;  %v234_v7 = vld [vmem:[%s619_s0 + $0x18] sm:$0xff] (!%p171_p3) }
   0x8   : > { %v241_v5 = vpack.c.bf16 (!%p171_p3), %v236_v4, %v235_v2  ;;  %v237_v8 = vld [vmem:[%s619_s0 + $0x30] sm:$0xff] (!%p171_p3)  ;;  %v238_v9 = vld [vmem:[%s619_s0 + $0x38] sm:$0xff] (!%p171_p3)  ;;  %v240_v11 = vpack.c.bf16 (!%p171_p3), %v234_v7, %v233_v6 }
   0x9   : > { %476 = vmatprep.mubr.msk.bf16.mxu0 (!%p171_p3), %vm258_vm0, %v239_v3  ;;  %v242_v12 = vpack.c.bf16 (!%p171_p3), %v238_v9, %v237_v8 }
   0xa   : > { %480 = vmatprep.mubr.msk.bf16.mxu1 (!%p171_p3), %vm258_vm0, %v241_v5 }
   0xe   : > { %s628_s12 = smov (!%p212_p4, %s525_s12), 1 }
   0xf   : > { %s467_s24 = sshll.u32 %s628_s12, 3  ;;  %s219_s11 = scalar_lea.vmem %s621_s2, %s628_s12 }
  0x10   : > { %s216_s29 = scalar_lea.vmem %s620_s1, %s467_s24  ;;  %s468_s16 = sshll.u32 %s628_s12, 6  ;;  %v459_v13 = vld [vmem:[%s219_s11] ss:$0 sm:$0xff] }
  0x11   : > { %v510_v10 = vld [vmem:[%s216_s29] sm:$0xff]   ;;  %s228_s19 = scalar_lea.vmem %s622_s3, %s468_s16 }
  0x12   : > { %474 = vmatprep.subr.bf16.mxu0 %v510_v10  ;;  %484 = vmatprep.subr.bf16.mxu1 %v510_v10 }
  0x13   : > { %475 = vmatpush3.bf16.msra.mxu0 %v510_v10  ;;  %485 = vmatpush3.bf16.msra.mxu1 %v510_v10 }
  0x16   : > { %477 = vmatmul.mubr.msk.bf16.vlgmr.msra.gmra.mrb[0].mxu0 %vm258_vm0, %v240_v11  ;;  %481 = vmatmul.mubr.msk.bf16.vlgmr.msra.gmra.mrb[0].mxu1 %vm258_vm0, %v242_v12 }
  0xe9   : > { %v478_v14 = vpop.f32.mrb[0].mxu0  ;;  %v482_v15 = vpop.f32.mrb[0].mxu1 }
  0xea   : > { %v314_v16 = vadd.f32 %v478_v14, %v459_v13  ;;  %v330_v17 = vadd.f32 %v482_v15, %v459_v13  ;;  %v305_v18 = vpop.f32.mrb[1].mxu0  ;;  %v321_v19 = vpop.f32.mrb[1].mxu1 }
  0xeb   : > { %v306_v20 = vadd.f32 %v459_v13, %v305_v18  ;;  %v322_v21 = vadd.f32 %v459_v13, %v321_v19  ;;  %v479_v22 = vpop.f32.mrb[2].mxu0  ;;  %v483_v23 = vpop.f32.mrb[2].mxu1 }
  0xec   : > { %338 = vst [vmem:[%s228_s19 + $0x10] sm:$0xff] %v314_v16  ;;  %342 = vst [vmem:[%s228_s19 + $0x30] sm:$0xff] %v330_v17  ;;  %v317_v24 = vadd.f32 %v479_v22, %v459_v13  ;;  %v333_v25 = vadd.f32 %v483_v23, %v459_v13  ;;  %v308_v26 = vpop.f32.mrb[3].mxu0  ;;  %v324_v27 = vpop.f32.mrb[3].mxu1 }
  0xed   : > { %336 = vst [vmem:[%s228_s19] sm:$0xff] %v306_v20  ;;  %340 = vst [vmem:[%s228_s19 + $0x20] sm:$0xff] %v322_v21  ;;  %v309_v28 = vadd.f32 %v459_v13, %v308_v26  ;;  %v325_v29 = vadd.f32 %v459_v13, %v324_v27 }
  0xee   : > { %339 = vst [vmem:[%s228_s19 + $0x18] sm:$0xff] %v317_v24  ;;  %343 = vst [vmem:[%s228_s19 + $0x38] sm:$0xff] %v333_v25 }
  0xef   : > { %337 = vst [vmem:[%s228_s19 + $0x8] sm:$0xff] %v309_v28  ;;  %341 = vst [vmem:[%s228_s19 + $0x28] sm:$0xff] %v325_v29 }
  0xf0 PF: > { %s13_s14 = sadd.s32 1, %s533_s14   ;;  %s623_s12 = smov %s529_s13 }
  0xf1   : > { %p10_p5 = scmp.ge.s32.totalorder %s13_s14, 4   ;;  %s624_s13 = smov %s626_s15 }
  0xf3   :  { %12 = sbr.rel (!%p10_p5) target bundleno = 2 (0x2), region = 68 }

// kernel: lstm_module_forward.5
= control target key start
LH: loop header
LB: loop body
LE: loop exit
PB: predicated region body
PF: predicated region fallthrough
CT: control target
= control target key end

     0   :  { %vm22_vm0 = vcmask 130048   ;;  %s736_s0 = inlined_call_operand.vmem [shape: f32[64,16], index: 0, kind: input, shape index: {}]   ;;  %s737_s1 = inlined_call_operand.vmem [shape: f32[1,16], index: 1, kind: input, shape index: {}]   ;;  %s738_s2 = inlined_call_operand.vmem [shape: f32[1,16], index: 2, kind: input, shape index: {}]   ;;  %s739_s3 = inlined_call_operand.vmem [shape: f32[64,16], index: 3, kind: output, shape index: {}]  }
   0x1   :  { %v14_v0 = vld [vmem:[%s736_s0] sm:$0xff]  ;;  %v16_v1 = vld [vmem:[%s736_s0 + $0x10] sm:$0xff]  ;;  %v15_v2 = vld [vmem:[%s736_s0 + $0x8] sm:$0xff] }
   0x2   :  { %v23_v3 = vsel %vm22_vm0, %v14_v0, 0.0  ;;  %v29_v4 = vsel %vm22_vm0, %v16_v1, 0.0  ;;  %v17_v5 = vld [vmem:[%s736_s0 + $0x18] sm:$0xff]  ;;  %v26_v6 = vsel %vm22_vm0, %v15_v2, 0.0  ;;  %v18_v8 = vld [vmem:[%s736_s0 + $0x20] sm:$0xff]  ;;  %v19_v9 = vld [vmem:[%s736_s0 + $0x28] sm:$0xff] }
   0x3   :  { %24 = vadd.xlane.f32.xlu0 %v23_v3  ;;  %30 = vadd.xlane.f32.xlu1 %v29_v4  ;;  %v32_v7 = vsel %vm22_vm0, %v17_v5, 0.0  ;;  %v35_v10 = vsel %vm22_vm0, %v18_v8, 0.0  ;;  %v38_v11 = vsel %vm22_vm0, %v19_v9, 0.0  ;;  %v20_v12 = vld [vmem:[%s736_s0 + $0x30] sm:$0xff]  ;;  %v21_v13 = vld [vmem:[%s736_s0 + $0x38] sm:$0xff] }
   0x4   :  { %v41_v14 = vsel %vm22_vm0, %v20_v12, 0.0  ;;  %v44_v15 = vsel %vm22_vm0, %v21_v13, 0.0 }
   0x7   :  { %27 = vadd.xlane.f32.xlu0 %v26_v6  ;;  %33 = vadd.xlane.f32.xlu1 %v32_v7 }
   0xb   :  { %36 = vadd.xlane.f32.xlu0 %v35_v10  ;;  %39 = vadd.xlane.f32.xlu1 %v38_v11  ;;  %v531_v11 = vld [vmem:[%s737_s1] ss:$0 sm:$0xff] }
   0xf   :  { %42 = vadd.xlane.f32.xlu0 %v41_v14  ;;  %45 = vadd.xlane.f32.xlu1 %v44_v15  ;;  %v537_v15 = vld [vmem:[%s738_s2] ss:$0 sm:$0xff] }
  0x90   :  { %v25_v16 = vpop.xlane.xlu0 %24  ;;  %v31_v17 = vpop.xlane.xlu1 %30 }
  0x91   :  { %v48_v18 = vmul.f32 0.0625, %v25_v16  ;;  %v50_v19 = vmul.f32 0.0625, %v31_v17 }
  0x93   :  { %v488_v20 = vsub.f32 %v14_v0, %v48_v18  ;;  %v490_v21 = vsub.f32 %v16_v1, %v50_v19 }
  0x94   :  { %v28_v22 = vpop.xlane.xlu0 %27  ;;  %v34_v23 = vpop.xlane.xlu1 %33 }
  0x95   :  { %v49_v24 = vmul.f32 0.0625, %v28_v22  ;;  %v51_v25 = vmul.f32 0.0625, %v34_v23  ;;  %v64_v26 = vmul.f32 %v488_v20, %v488_v20  ;;  %v66_v27 = vmul.f32 %v490_v21, %v490_v21 }
  0x97   :  { %v496_v28 = vsub.f32 %v15_v2, %v49_v24  ;;  %v498_v29 = vsub.f32 %v17_v5, %v51_v25  ;;  %v72_v30 = vsel %vm22_vm0, %v64_v26, 0.0  ;;  %v78_v33 = vsel %vm22_vm0, %v66_v27, 0.0 }
  0x98   :  { %73 = vadd.xlane.f32.xlu0 %v72_v30  ;;  %v37_v31 = vpop.xlane.xlu0 %36  ;;  %v40_v32 = vpop.xlane.xlu1 %39 }
  0x99   :  { %v52_v34 = vmul.f32 0.0625, %v37_v31  ;;  %v53_v35 = vmul.f32 0.0625, %v40_v32  ;;  %v65_v36 = vmul.f32 %v496_v28, %v496_v28  ;;  %v67_v37 = vmul.f32 %v498_v29, %v498_v29 }
  0x9b   :  { %v506_v38 = vsub.f32 %v18_v8, %v52_v34  ;;  %v508_v39 = vsub.f32 %v19_v9, %v53_v35  ;;  %v75_v40 = vsel %vm22_vm0, %v65_v36, 0.0  ;;  %v81_v43 = vsel %vm22_vm0, %v67_v37, 0.0 }
  0x9c   :  { %79 = vadd.xlane.f32.xlu0 %v78_v33  ;;  %76 = vadd.xlane.f32.xlu1 %v75_v40  ;;  %v43_v41 = vpop.xlane.xlu0 %42  ;;  %v46_v42 = vpop.xlane.xlu1 %45 }
  0x9d   :  { %v54_v44 = vmul.f32 0.0625, %v43_v41  ;;  %v55_v45 = vmul.f32 0.0625, %v46_v42  ;;  %v68_v46 = vmul.f32 %v506_v38, %v506_v38  ;;  %v69_v47 = vmul.f32 %v508_v39, %v508_v39 }
  0x9f   :  { %v516_v48 = vsub.f32 %v20_v12, %v54_v44  ;;  %v518_v49 = vsub.f32 %v21_v13, %v55_v45  ;;  %v84_v50 = vsel %vm22_vm0, %v68_v46, 0.0  ;;  %v87_v51 = vsel %vm22_vm0, %v69_v47, 0.0 }
  0xa0   :  { %82 = vadd.xlane.f32.xlu1 %v81_v43  ;;  %85 = vadd.xlane.f32.xlu0 %v84_v50 }
  0xa1   :  { %v70_v52 = vmul.f32 %v516_v48, %v516_v48  ;;  %v71_v53 = vmul.f32 %v518_v49, %v518_v49 }
  0xa3   :  { %v90_v54 = vsel %vm22_vm0, %v70_v52, 0.0  ;;  %v93_v55 = vsel %vm22_vm0, %v71_v53, 0.0 }
  0xa4   :  { %88 = vadd.xlane.f32.xlu1 %v87_v51  ;;  %91 = vadd.xlane.f32.xlu0 %v90_v54 }
  0xa8   :  { %94 = vadd.xlane.f32.xlu1 %v93_v55 }
 0x125   :  { %v74_v56 = vpop.xlane.xlu0 %73 }
 0x126   :  { %v96_v57 = vmul.f32 0.0625, %v74_v56 }
 0x128   :  { %v104_v58 = vadd.f32 1e-05, %v96_v57 }
 0x129   :  { %v77_v59 = vpop.xlane.xlu1 %76  ;;  %v80_v60 = vpop.xlane.xlu0 %79 }
 0x12a   :  { %388 = vrsqrt.f32 %v104_v58  ;;  %v97_v61 = vmul.f32 0.0625, %v77_v59  ;;  %v98_v62 = vmul.f32 0.0625, %v80_v60 }
 0x12c   :  { %v105_v63 = vadd.f32 1e-05, %v97_v61  ;;  %v106_v0 = vadd.f32 1e-05, %v98_v62 }
 0x12d   :  { %v83_v1 = vpop.xlane.xlu1 %82  ;;  %v86_v2 = vpop.xlane.xlu0 %85 }
 0x12e   :  { %390 = vrsqrt.f32 %v105_v63  ;;  %v99_v3 = vmul.f32 0.0625, %v83_v1  ;;  %v100_v4 = vmul.f32 0.0625, %v86_v2 }
 0x12f   :  { %392 = vrsqrt.f32 %v106_v0 }
 0x130   :  { %v107_v5 = vadd.f32 1e-05, %v99_v3  ;;  %v108_v6 = vadd.f32 1e-05, %v100_v4 }
 0x131   :  { %v89_v7 = vpop.xlane.xlu1 %88  ;;  %v92_v9 = vpop.xlane.xlu0 %91 }
 0x132   :  { %394 = vrsqrt.f32 %v107_v5  ;;  %v101_v8 = vmul.f32 0.0625, %v89_v7  ;;  %v102_v13 = vmul.f32 0.0625, %v92_v9 }
 0x133   :  { %396 = vrsqrt.f32 %v108_v6 }
 0x134   :  { %v389_v10 = vpop.eup %388  ;;  %v109_v16 = vadd.f32 1e-05, %v101_v8  ;;  %v110_v25 = vadd.f32 1e-05, %v102_v13 }
 0x135   :  { %v120_v12 = vmul.f32 %v389_v10, %v488_v20  ;;  %v95_v14 = vpop.xlane.xlu1 %94 }
 0x136   :  { %v103_v17 = vmul.f32 0.0625, %v95_v14  ;;  %398 = vrsqrt.f32 %v109_v16 }
 0x137   :  { %v135_v18 = vmul.f32 %v531_v11, %v120_v12  ;;  %400 = vrsqrt.f32 %v110_v25 }
 0x138   :  { %v391_v19 = vpop.eup %390  ;;  %v111_v26 = vadd.f32 1e-05, %v103_v17 }
 0x139   :  { %v393_v22 = vpop.eup %392  ;;  %v541_v23 = vadd.f32 %v537_v15, %v135_v18  ;;  %v121_v24 = vmul.f32 %v391_v19, %v496_v28 }
 0x13a   :  { %v122_v20 = vmul.f32 %v393_v22, %v490_v21  ;;  %402 = vrsqrt.f32 %v111_v26 }
 0x13b   :  { %v546_v27 = vmul.f32 0.70710677, %v541_v23  ;;  %v136_v30 = vmul.f32 %v531_v11, %v121_v24  ;;  %v602_v17 = vmul.f32 0.5, %v541_v23 }
 0x13c   :  { %v395_v31 = vpop.eup %394  ;;  %v137_v32 = vmul.f32 %v531_v11, %v122_v20 }
 0x13d   :  { %v397_v33 = vpop.eup %396  ;;  %v174_v34 = vand.u32 2147483647, %v546_v27  ;;  %v552_v35 = vadd.f32 %v537_v15, %v136_v30  ;;  %v123_v28 = vmul.f32 %v395_v31, %v498_v29  ;;  %vm334_vm1 = vcmp.lt.f32.partialorder %v546_v27, 0.0 }
 0x13e   :  { %v556_v21 = vadd.f32 %v537_v15, %v137_v32  ;;  %v124_v36 = vmul.f32 %v397_v33, %v506_v38 }
 0x13f   :  { %v182_v37 = vmul.f32 0.3275911, %v174_v34  ;;  %v560_v40 = vmul.f32 0.70710677, %v552_v35  ;;  %v138_v42 = vmul.f32 %v531_v11, %v123_v28  ;;  %v286_v51 = vsub.f32 0.0, %v174_v34 }
 0x140   :  { %v563_v41 = vmul.f32 0.70710677, %v556_v21  ;;  %v139_v43 = vmul.f32 %v531_v11, %v124_v36  ;;  %v399_v50 = vpop.eup %398 }
 0x141   :  { %v190_v44 = vadd.f32 1.0, %v182_v37  ;;  %v175_v29 = vand.u32 2147483647, %v560_v40  ;;  %v570_v46 = vadd.f32 %v537_v15, %v138_v42  ;;  %v401_v57 = vpop.eup %400  ;;  %v125_v59 = vmul.f32 %v399_v50, %v508_v39 }
 0x142   :  { %v176_v45 = vand.u32 2147483647, %v563_v41  ;;  %v573_v47 = vadd.f32 %v537_v15, %v139_v43  ;;  %v294_v61 = vmul.f32 %v286_v51, %v174_v34  ;;  %v126_v3 = vmul.f32 %v401_v57, %v516_v48 }
 0x143   :  { %404 = vrcp.f32 %v190_v44  ;;  %v183_v38 = vmul.f32 0.3275911, %v175_v29  ;;  %v576_v53 = vmul.f32 0.70710677, %v570_v46  ;;  %v287_v62 = vsub.f32 0.0, %v175_v29 }
 0x144   :  { %v184_v52 = vmul.f32 0.3275911, %v176_v45  ;;  %v580_v58 = vmul.f32 0.70710677, %v573_v47  ;;  %v403_v60 = vpop.eup %402  ;;  %v140_v1 = vmul.f32 %v531_v11, %v125_v59  ;;  %v302_v7 = vmul.f32 1.442695, %v294_v61 }
 0x145   :  { %v191_v54 = vadd.f32 1.0, %v183_v38  ;;  %v177_v56 = vand.u32 2147483647, %v576_v53  ;;  %v127_v6 = vmul.f32 %v403_v60, %v518_v49  ;;  %v295_v39 = vmul.f32 %v287_v62, %v175_v29 }
 0x146   :  { %v192_v55 = vadd.f32 1.0, %v184_v52  ;;  %v178_v0 = vand.u32 2147483647, %v580_v58  ;;  %v587_v5 = vadd.f32 %v537_v15, %v140_v1  ;;  %v141_v8 = vmul.f32 %v531_v11, %v126_v3 }
 0x147   :  { %406 = vrcp.f32 %v191_v54  ;;  %v185_v63 = vmul.f32 0.3275911, %v177_v56  ;;  %v288_v10 = vsub.f32 0.0, %v176_v45  ;;  %v289_v12 = vsub.f32 0.0, %v177_v56 }
 0x148   :  { %408 = vrcp.f32 %v192_v55  ;;  %v186_v4 = vmul.f32 0.3275911, %v178_v0  ;;  %v594_v14 = vmul.f32 0.70710677, %v587_v5  ;;  %v598_v16 = vadd.f32 %v537_v15, %v141_v8 }
 0x149   :  { %v193_v2 = vadd.f32 1.0, %v185_v63  ;;  %v142_v49 = vmul.f32 %v531_v11, %v127_v6  ;;  %v290_v18 = vsub.f32 0.0, %v178_v0  ;;  %v304_v24 = vmul.f32 1.442695, %v295_v39 }
 0x14a   :  { %v194_v13 = vadd.f32 1.0, %v186_v4  ;;  %v179_v19 = vand.u32 2147483647, %v594_v14  ;;  %v606_v25 = vmul.f32 0.70710677, %v598_v16  ;;  %v296_v26 = vmul.f32 %v288_v10, %v176_v45 }
 0x14b   :  { %410 = vrcp.f32 %v193_v2  ;;  %v297_v30 = vmul.f32 %v289_v12, %v177_v56  ;;  %v616_v34 = vadd.f32 %v537_v15, %v142_v49  ;;  %v298_v36 = vmul.f32 %v290_v18, %v178_v0 }
 0x14c   :  { %412 = vrcp.f32 %v194_v13  ;;  %v187_v31 = vmul.f32 0.3275911, %v179_v19  ;;  %v180_v33 = vand.u32 2147483647, %v606_v25  ;;  %v291_v42 = vsub.f32 0.0, %v179_v19 }
 0x14d   :  { %v591_v9 = vpop.eup %404  ;;  %414 = vpow2.f32 %v302_v7  ;;  %v306_v38 = vmul.f32 1.442695, %v296_v26  ;;  %v308_v50 = vmul.f32 1.442695, %v297_v30  ;;  %v624_v55 = vmul.f32 0.70710677, %v616_v34 }
 0x14e   :  { %v214_v48 = vmul.f32 1.0614054, %v591_v9  ;;  %v195_v37 = vadd.f32 1.0, %v187_v31  ;;  %416 = vpow2.f32 %v304_v24  ;;  %v188_v29 = vmul.f32 0.3275911, %v180_v33 }
 0x14f   :  { %v310_v59 = vmul.f32 1.442695, %v298_v36  ;;  %v299_v60 = vmul.f32 %v291_v42, %v179_v19  ;;  %v629_v63 = vand.u32 2147483647, %v624_v55  ;;  %v292_v3 = vsub.f32 0.0, %v180_v33 }
 0x150   :  { %v222_v22 = vadd.f32 -1.4531521, %v214_v48  ;;  %418 = vrcp.f32 %v195_v37  ;;  %v196_v54 = vadd.f32 1.0, %v188_v29  ;;  %v638_v10 = vmul.f32 0.5, %v552_v35 }
 0x151   :  { %v608_v20 = vpop.eup %406  ;;  %v189_v39 = vmul.f32 0.3275911, %v629_v63  ;;  %v312_v48 = vmul.f32 1.442695, %v299_v60  ;;  %v300_v26 = vmul.f32 %v292_v3, %v180_v33  ;;  %v649_v36 = vmul.f32 0.5, %v556_v21 }
 0x152   :  { %v610_v32 = vpop.eup %408  ;;  %v230_v11 = vmul.f32 %v591_v9, %v222_v22  ;;  %v215_v23 = vmul.f32 1.0614054, %v608_v20  ;;  %420 = vrcp.f32 %v196_v54  ;;  %vm335_vm2 = vcmp.lt.f32.partialorder %v560_v40, 0.0 }
 0x153   :  { %v216_v28 = vmul.f32 1.0614054, %v610_v32  ;;  %422 = vpow2.f32 %v306_v38  ;;  %v197_v30 = vadd.f32 1.0, %v189_v39  ;;  %v314_v38 = vmul.f32 1.442695, %v300_v26 }
 0x154   :  { %v238_v43 = vadd.f32 1.4214138, %v230_v11  ;;  %v223_v44 = vadd.f32 -1.4531521, %v215_v23  ;;  %424 = vpow2.f32 %v308_v50  ;;  %vm336_vm3 = vcmp.lt.f32.partialorder %v563_v41, 0.0 }
 0x155   :  { %v224_v45 = vadd.f32 -1.4531521, %v216_v28  ;;  %v619_v51 = vpop.eup %410  ;;  %426 = vpow2.f32 %v310_v59  ;;  %vm337_vm4 = vcmp.lt.f32.partialorder %v576_v53, 0.0  ;;  %vm338_vm5 = vcmp.lt.f32.partialorder %v580_v58, 0.0 }
 0x156   :  { %v246_v52 = vmul.f32 %v591_v9, %v238_v43  ;;  %v231_v15 = vmul.f32 %v608_v20, %v223_v44  ;;  %v217_v57 = vmul.f32 1.0614054, %v619_v51  ;;  %v631_v0 = vpop.eup %412  ;;  %428 = vrcp.f32 %v197_v30 }
 0x157   :  { %v232_v56 = vmul.f32 %v610_v32, %v224_v45  ;;  %v218_v7 = vmul.f32 1.0614054, %v631_v0  ;;  %v415_v8 = vpop.eup %414  ;;  %430 = vpow2.f32 %v312_v48  ;;  %vm339_vm6 = vcmp.lt.f32.partialorder %v594_v14, 0.0 }
 0x158   :  { %v254_v61 = vadd.f32 -0.28449672, %v246_v52  ;;  %v239_v62 = vadd.f32 1.4214138, %v231_v15  ;;  %v225_v2 = vadd.f32 -1.4531521, %v217_v57  ;;  %v417_v31 = vpop.eup %416  ;;  %432 = vpow2.f32 %v314_v38 }
 0x159   :  { %v240_v1 = vadd.f32 1.4214138, %v232_v56  ;;  %v226_v19 = vadd.f32 -1.4531521, %v218_v7  ;;  %vm340_vm7 = vcmp.lt.f32.partialorder %v606_v25, 0.0  ;;  %vm341_vm8 = vcmp.lt.f32.partialorder %v624_v55, 0.0 }
 0x15a   :  { %v262_v4 = vmul.f32 %v591_v9, %v254_v61  ;;  %v247_v6 = vmul.f32 %v608_v20, %v239_v62  ;;  %v233_v13 = vmul.f32 %v619_v51, %v225_v2  ;;  %v646_v28 = vpop.eup %418  ;;  %v293_v61 = vsub.f32 0.0, %v629_v63 }
 0x15b   :  { %v248_v12 = vmul.f32 %v610_v32, %v240_v1  ;;  %v234_v23 = vmul.f32 %v631_v0, %v226_v19 }
 0x15c   :  { %v270_v49 = vadd.f32 0.2548296, %v262_v4  ;;  %v255_v18 = vadd.f32 -0.28449672, %v247_v6  ;;  %v241_v24 = vadd.f32 1.4214138, %v233_v13  ;;  %v655_v50 = vpop.eup %420  ;;  %v301_v27 = vmul.f32 %v293_v61, %v629_v63 }
 0x15d   :  { %v256_v22 = vadd.f32 -0.28449672, %v248_v12  ;;  %v242_v44 = vadd.f32 1.4214138, %v234_v23  ;;  %v423_v56 = vpop.eup %422  ;;  %v220_v60 = vmul.f32 1.0614054, %v655_v50 }
 0x15e   :  { %v278_v11 = vmul.f32 %v591_v9, %v270_v49  ;;  %v263_v35 = vmul.f32 %v608_v20, %v255_v18  ;;  %v249_v42 = vmul.f32 %v619_v51, %v241_v24  ;;  %v219_v9 = vmul.f32 1.0614054, %v646_v28  ;;  %v425_v7 = vpop.eup %424 }
 0x15f   :  { %v264_v37 = vmul.f32 %v610_v32, %v256_v22  ;;  %v250_v15 = vmul.f32 %v631_v0, %v242_v44  ;;  %v228_v6 = vadd.f32 -1.4531521, %v220_v60  ;;  %v427_v19 = vpop.eup %426  ;;  %v161_v60 = vmul.f32 0.5, %v570_v46 }
 0x160   :  { %v318_v33 = vmul.f32 %v415_v8, %v278_v11  ;;  %v271_v43 = vadd.f32 0.2548296, %v263_v35  ;;  %v257_v45 = vadd.f32 -0.28449672, %v249_v42  ;;  %v227_v54 = vadd.f32 -1.4531521, %v219_v9  ;;  %v673_v30 = vpop.eup %428 }
 0x161   :  { %v272_v29 = vadd.f32 0.2548296, %v264_v37  ;;  %v258_v2 = vadd.f32 -0.28449672, %v250_v15  ;;  %v236_v18 = vmul.f32 %v655_v50, %v228_v6  ;;  %v316_v15 = vmul.f32 1.442695, %v301_v27 }
 0x162   :  { %v326_v21 = vsub.f32 1.0, %v318_v33  ;;  %v279_v52 = vmul.f32 %v608_v20, %v271_v43  ;;  %v265_v59 = vmul.f32 %v619_v51, %v257_v45  ;;  %v235_v3 = vmul.f32 %v646_v28, %v227_v54  ;;  %v431_v43 = vpop.eup %430 }
 0x163   :  { %v280_v57 = vmul.f32 %v610_v32, %v272_v29  ;;  %v266_v8 = vmul.f32 %v631_v0, %v258_v2  ;;  %v244_v23 = vadd.f32 1.4214138, %v236_v18  ;;  %v221_v33 = vmul.f32 1.0614054, %v673_v30 }
 0x164   :  { %v342_v62 = vsub.f32 0.0, %v326_v21  ;;  %v319_v1 = vmul.f32 %v417_v31, %v279_v52  ;;  %v273_v4 = vadd.f32 0.2548296, %v265_v59  ;;  %v243_v12 = vadd.f32 1.4214138, %v235_v3  ;;  %v433_v59 = vpop.eup %432 }
 0x165   :  { %v320_v20 = vmul.f32 %v423_v56, %v280_v57  ;;  %v274_v24 = vadd.f32 0.2548296, %v266_v8  ;;  %v252_v9 = vmul.f32 %v655_v50, %v244_v23  ;;  %v229_v45 = vadd.f32 -1.4531521, %v221_v33 }
 0x166   :  { %v350_v39 = vsel %vm334_vm1, %v342_v62, %v326_v21  ;;  %v327_v32 = vsub.f32 1.0, %v319_v1  ;;  %v281_v49 = vmul.f32 %v619_v51, %v273_v4  ;;  %v251_v26 = vmul.f32 %v646_v28, %v243_v12 }
 0x167   :  { %v358_v13 = vadd.f32 1.0, %v350_v39  ;;  %v328_v48 = vsub.f32 1.0, %v320_v20  ;;  %v282_v51 = vmul.f32 %v631_v0, %v274_v24  ;;  %v260_v52 = vadd.f32 -0.28449672, %v252_v9 }
 0x168   :  { %v343_v22 = vsub.f32 0.0, %v327_v32  ;;  %v321_v35 = vmul.f32 %v425_v7, %v281_v49  ;;  %v259_v42 = vadd.f32 -0.28449672, %v251_v26  ;;  %v237_v41 = vmul.f32 %v673_v30, %v229_v45 }
 0x169   :  { %v366_v31 = vmul.f32 %v358_v13, %v602_v17  ;;  %v344_v11 = vsub.f32 0.0, %v328_v48  ;;  %v322_v29 = vmul.f32 %v427_v19, %v282_v51  ;;  %v268_v61 = vmul.f32 %v655_v50, %v260_v52 }
 0x16a   :  { %v351_v37 = vsel %vm335_vm2, %v343_v22, %v327_v32  ;;  %v329_v44 = vsub.f32 1.0, %v321_v35  ;;  %v267_v0 = vmul.f32 %v646_v28, %v259_v42  ;;  %v245_v2 = vadd.f32 1.4214138, %v237_v41 }
 0x16b   :  { %374 = vst.msk [vmem:[%s739_s3] sm:$0xff] %vm22_vm0, %v366_v31  ;;  %v359_v63 = vadd.f32 1.0, %v351_v37  ;;  %v352_v17 = vsel %vm336_vm3, %v344_v11, %v328_v48  ;;  %v330_v56 = vsub.f32 1.0, %v322_v29  ;;  %v276_v3 = vadd.f32 0.2548296, %v268_v61 }
 0x16c   :  { %v360_v40 = vadd.f32 1.0, %v352_v17  ;;  %v345_v21 = vsub.f32 0.0, %v329_v44  ;;  %v275_v57 = vadd.f32 0.2548296, %v267_v0  ;;  %434 = vpow2.f32 %v316_v15 }
 0x16d   :  { %v367_v38 = vmul.f32 %v359_v63, %v638_v10  ;;  %v346_v62 = vsub.f32 0.0, %v330_v56  ;;  %v253_v4 = vmul.f32 %v673_v30, %v245_v2  ;;  %v162_v6 = vmul.f32 0.5, %v573_v47 }
 0x16e   :  { %v368_v54 = vmul.f32 %v360_v40, %v649_v36  ;;  %v353_v10 = vsel %vm337_vm4, %v345_v21, %v329_v44  ;;  %v283_v1 = vmul.f32 %v646_v28, %v275_v57  ;;  %v284_v39 = vmul.f32 %v655_v50, %v276_v3 }
 0x16f   :  { %375 = vst.msk [vmem:[%s739_s3 + $0x8] sm:$0xff] %vm22_vm0, %v367_v38  ;;  %v361_v36 = vadd.f32 1.0, %v353_v10  ;;  %v354_v20 = vsel %vm338_vm5, %v346_v62, %v330_v56  ;;  %v261_v32 = vadd.f32 -0.28449672, %v253_v4  ;;  %v163_v49 = vmul.f32 0.5, %v587_v5 }
 0x170   :  { %376 = vst.msk [vmem:[%s739_s3 + $0x10] sm:$0xff] %vm22_vm0, %v368_v54  ;;  %v323_v53 = vmul.f32 %v431_v43, %v283_v1  ;;  %v362_v7 = vadd.f32 1.0, %v354_v20  ;;  %v324_v8 = vmul.f32 %v433_v59, %v284_v39  ;;  %v164_v31 = vmul.f32 0.5, %v598_v16 }
 0x171   :  { %v369_v46 = vmul.f32 %v361_v36, %v161_v60  ;;  %v269_v13 = vmul.f32 %v673_v30, %v261_v32  ;;  %v165_v16 = vmul.f32 0.5, %v616_v34 }
 0x172   :  { %v331_v28 = vsub.f32 1.0, %v323_v53  ;;  %v370_v58 = vmul.f32 %v362_v7, %v162_v6  ;;  %v332_v47 = vsub.f32 1.0, %v324_v8 }
 0x173   :  { %377 = vst.msk [vmem:[%s739_s3 + $0x18] sm:$0xff] %vm22_vm0, %v369_v46  ;;  %v277_v48 = vadd.f32 0.2548296, %v269_v13 }
 0x174   :  { %v347_v12 = vsub.f32 0.0, %v331_v28  ;;  %378 = vst.msk [vmem:[%s739_s3 + $0x20] sm:$0xff] %vm22_vm0, %v370_v58  ;;  %v348_v19 = vsub.f32 0.0, %v332_v47 }
 0x175   :  { %v285_v22 = vmul.f32 %v673_v30, %v277_v48 }
 0x176   :  { %v355_v50 = vsel %vm339_vm6, %v347_v12, %v331_v28  ;;  %v435_v24 = vpop.eup %434  ;;  %v356_v27 = vsel %vm340_vm7, %v348_v19, %v332_v47 }
 0x177   :  { %v363_v18 = vadd.f32 1.0, %v355_v50  ;;  %v364_v11 = vadd.f32 1.0, %v356_v27  ;;  %v325_v35 = vmul.f32 %v435_v24, %v285_v22 }
 0x179   :  { %v371_v26 = vmul.f32 %v363_v18, %v163_v49  ;;  %v372_v14 = vmul.f32 %v364_v11, %v164_v31  ;;  %v333_v5 = vsub.f32 1.0, %v325_v35 }
 0x17b   :  { %379 = vst.msk [vmem:[%s739_s3 + $0x28] sm:$0xff] %vm22_vm0, %v371_v26  ;;  %380 = vst.msk [vmem:[%s739_s3 + $0x30] sm:$0xff] %vm22_vm0, %v372_v14  ;;  %v349_v25 = vsub.f32 0.0, %v333_v5 }
 0x17d   :  { %v357_v30 = vsel %vm341_vm8, %v349_v25, %v333_v5 }
 0x17e   :  { %v365_v23 = vadd.f32 1.0, %v357_v30 }
 0x180   :  { %v373_v37 = vmul.f32 %v365_v23, %v165_v16 }
 0x182   :  { %381 = vst.msk [vmem:[%s739_s3 + $0x38] sm:$0xff] %vm22_vm0, %v373_v37 }

// kernel: lstm_module_forward.8
= control target key start
LH: loop header
LB: loop body
LE: loop exit
PB: predicated region body
PF: predicated region fallthrough
CT: control target
= control target key end

     0   :  { %s600_s12 = smov 0   ;;  %s602_s13 = smov 0   ;;  %s669_s0 = inlined_call_operand.vmem [shape: f32[64,64], index: 0, kind: input, shape index: {}]   ;;  %s670_s1 = inlined_call_operand.vmem [shape: bf16[2,64,128], index: 1, kind: input, shape index: {}]   ;;  %s671_s2 = inlined_call_operand.vmem [shape: f32[2,1,128], index: 2, kind: input, shape index: {}]   ;;  %s672_s3 = inlined_call_operand.vmem [shape: f32[2,64,128], index: 3, kind: output, shape index: {}]  }
   0x1   :  { %s604_s14 = smov 0  }
   0x2 LB: > { %s25_s15 = sadd.s32 1, %s574_s13  ;;  %p478_p0 = scmp.ge.s32.totalorder %s578_s14, 1  ;;  %s578_s14 = sphi %s604_s14, %s13_s14   ;;  %s574_s13 = sphi %s602_s13, %s674_s13   ;;  %s570_s12 = sphi %s600_s12, %s673_s12  }
   0x3   : > { %p27_p1 = scmp.ge.s32.totalorder %s25_s15, 2  ;;  %p170_p2 = scmp.lt.s32.totalorder %s578_s14, 3 }
   0x5   : > { %s676_s15 = smov (%p27_p1, %s25_s15), 0  ;;  %p171_p3 = pnand %p478_p0, %p170_p2 }
   0x6   : > { %p212_p4 = scmp.lt.s32.totalorder (!%p171_p3), %s570_s12, 1  ;;  %v231_v0 = vld [vmem:[%s669_s0] sm:$0xff] (!%p171_p3)  ;;  %v232_v1 = vld [vmem:[%s669_s0 + $0x8] sm:$0xff] (!%p171_p3)  ;;  %vm282_vm0 = vcmask (!%p171_p3), 523264   ;;  %v233_v10 = vld [vmem:[%s669_s0 + $0x10] sm:$0xff] (!%p171_p3) }
   0x7   : > { %174 = sbr.rel (%p171_p3) target bundleno = 252 (0xfc), region = 32  ;;  %v235_v2 = vld [vmem:[%s669_s0 + $0x20] sm:$0xff] (!%p171_p3)  ;;  %v239_v3 = vpack.c.bf16 (!%p171_p3), %v232_v1, %v231_v0  ;;  %v236_v4 = vld [vmem:[%s669_s0 + $0x28] sm:$0xff] (!%p171_p3)  ;;  %v234_v11 = vld [vmem:[%s669_s0 + $0x18] sm:$0xff] (!%p171_p3) }
   0x8   : > { %v241_v5 = vpack.c.bf16 (!%p171_p3), %v236_v4, %v235_v2  ;;  %v237_v12 = vld [vmem:[%s669_s0 + $0x30] sm:$0xff] (!%p171_p3)  ;;  %v238_v13 = vld [vmem:[%s669_s0 + $0x38] sm:$0xff] (!%p171_p3)  ;;  %v240_v14 = vpack.c.bf16 (!%p171_p3), %v234_v11, %v233_v10 }
   0x9   : > { %512 = vmatprep.mubr.msk.bf16.mxu0 (!%p171_p3), %vm282_vm0, %v239_v3  ;;  %v242_v15 = vpack.c.bf16 (!%p171_p3), %v238_v13, %v237_v12 }
   0xa   : > { %516 = vmatprep.mubr.msk.bf16.mxu1 (!%p171_p3), %vm282_vm0, %v241_v5 }
   0xe   : > { %s678_s12 = smov (!%p212_p4, %s570_s12), 1 }
   0xf   : > { %s494_s24 = sshll.u32 %s678_s12, 5  ;;  %s219_s11 = scalar_lea.vmem %s671_s2, %s678_s12 }
  0x10   : > { %s216_s27 = scalar_lea.vmem %s670_s1, %s494_s24  ;;  %s495_s16 = sshll.u32 %s678_s12, 6  ;;  %v483_v16 = vld [vmem:[%s219_s11] ss:$0 sm:$0xff] }
  0x11   : > { %v552_v6 = vld [vmem:[%s216_s27] sm:$0xff]   ;;  %v553_v7 = vld [vmem:[%s216_s27 + $0x8] sm:$0xff]   ;;  %v554_v8 = vld [vmem:[%s216_s27 + $0x10] sm:$0xff]   ;;  %s228_s19 = scalar_lea.vmem %s672_s3, %s495_s16 }
  0x12   : > { %504 = vmatprep.subr.bf16.mxu0 %v552_v6  ;;  %520 = vmatprep.subr.bf16.mxu1 %v552_v6  ;;  %v555_v9 = vld [vmem:[%s216_s27 + $0x18] sm:$0xff]  }
  0x13   : > { %505 = vmatpush3.bf16.msra.mxu0 %v552_v6  ;;  %524 = vmatpush3.bf16.msra.mxu1 %v552_v6 }
  0x14   : > { %506 = vmatprep.subr.bf16.mxu0 %v553_v7  ;;  %521 = vmatprep.subr.bf16.mxu1 %v553_v7 }
  0x17   : > { %507 = vmatpush3.bf16.msra.mxu0 %v553_v7  ;;  %525 = vmatpush3.bf16.msra.mxu1 %v553_v7 }
  0x18   : > { %508 = vmatprep.subr.bf16.mxu0 %v554_v8  ;;  %522 = vmatprep.subr.bf16.mxu1 %v554_v8 }
  0x1b   : > { %509 = vmatpush3.bf16.msra.mxu0 %v554_v8  ;;  %526 = vmatpush3.bf16.msra.mxu1 %v554_v8 }
  0x1c   : > { %510 = vmatprep.subr.bf16.mxu0 %v555_v9  ;;  %523 = vmatprep.subr.bf16.mxu1 %v555_v9 }
  0x1f   : > { %511 = vmatpush3.bf16.msra.mxu0 %v555_v9  ;;  %527 = vmatpush3.bf16.msra.mxu1 %v555_v9 }
  0x22   : > { %513 = vmatmul.mubr.msk.bf16.vlgmr.msra.gmra.mrb[0].mxu0 %vm282_vm0, %v240_v14  ;;  %517 = vmatmul.mubr.msk.bf16.vlgmr.msra.gmra.mrb[0].mxu1 %vm282_vm0, %v242_v15 }
  0xf5   : > { %v514_v17 = vpop.f32.mrb[0].mxu0  ;;  %v518_v18 = vpop.f32.mrb[0].mxu1 }
  0xf6   : > { %v338_v19 = vadd.f32 %v514_v17, %v483_v16  ;;  %v354_v20 = vadd.f32 %v518_v18, %v483_v16  ;;  %v329_v21 = vpop.f32.mrb[1].mxu0  ;;  %v345_v22 = vpop.f32.mrb[1].mxu1 }
  0xf7   : > { %v330_v23 = vadd.f32 %v483_v16, %v329_v21  ;;  %v346_v24 = vadd.f32 %v483_v16, %v345_v22  ;;  %v515_v25 = vpop.f32.mrb[2].mxu0  ;;  %v519_v26 = vpop.f32.mrb[2].mxu1 }
  0xf8   : > { %362 = vst [vmem:[%s228_s19 + $0x10] sm:$0xff] %v338_v19  ;;  %366 = vst [vmem:[%s228_s19 + $0x30] sm:$0xff] %v354_v20  ;;  %v341_v27 = vadd.f32 %v515_v25, %v483_v16  ;;  %v357_v28 = vadd.f32 %v519_v26, %v483_v16  ;;  %v332_v29 = vpop.f32.mrb[3].mxu0  ;;  %v348_v30 = vpop.f32.mrb[3].mxu1 }
  0xf9   : > { %360 = vst [vmem:[%s228_s19] sm:$0xff] %v330_v23  ;;  %364 = vst [vmem:[%s228_s19 + $0x20] sm:$0xff] %v346_v24  ;;  %v333_v31 = vadd.f32 %v483_v16, %v332_v29  ;;  %v349_v32 = vadd.f32 %v483_v16, %v348_v30 }
  0xfa   : > { %363 = vst [vmem:[%s228_s19 + $0x18] sm:$0xff] %v341_v27  ;;  %367 = vst [vmem:[%s228_s19 + $0x38] sm:$0xff] %v357_v28 }
  0xfb   : > { %361 = vst [vmem:[%s228_s19 + $0x8] sm:$0xff] %v333_v31  ;;  %365 = vst [vmem:[%s228_s19 + $0x28] sm:$0xff] %v349_v32 }
  0xfc PF: > { %s13_s14 = sadd.s32 1, %s578_s14   ;;  %s673_s12 = smov %s574_s13 }
  0xfd   : > { %p10_p5 = scmp.ge.s32.totalorder %s13_s14, 4   ;;  %s674_s13 = smov %s676_s15 }
  0xff   :  { %12 = sbr.rel (!%p10_p5) target bundleno = 2 (0x2), region = 68 }

// kernel: lstm_module_forward.7
= control target key start
LH: loop header
LB: loop body
LE: loop exit
PB: predicated region body
PF: predicated region fallthrough
CT: control target
= control target key end

     0   :  { %s1433_s9 = smov 0   ;;  %s1435_s10 = smov 0   ;;  %s1717_s0 = inlined_call_operand.vmem [shape: f32[2,64,128], index: 0, kind: input, shape index: {}]   ;;  %s1718_s1 = inlined_call_operand.vmem [shape: bf16[2,32,128], index: 1, kind: input, shape index: {}]   ;;  %s1719_s2 = inlined_call_operand.vmem [shape: f32[2,64,32], index: 2, kind: output, shape index: {}]  }
   0x1   :  { %s1437_s11 = smov 0  }
   0x2 LB: > { %s24_s12 = sadd.s32 1, %s1407_s10  ;;  %p1174_p0 = scmp.ge.s32.totalorder %s1411_s11, 1  ;;  %s1411_s11 = sphi %s1437_s11, %s12_s11   ;;  %s1407_s10 = sphi %s1435_s10, %s1721_s10   ;;  %s1403_s9 = sphi %s1433_s9, %s1720_s9  }
   0x3   : > { %p26_p1 = scmp.ge.s32.totalorder %s24_s12, 2  ;;  %p167_p2 = scmp.lt.s32.totalorder %s1411_s11, 3 }
   0x5   : > { %s1723_s12 = smov (%p26_p1, %s24_s12), 0  ;;  %p168_p3 = pnand %p1174_p0, %p167_p2 }
   0x6   : > { %p215_p4 = scmp.lt.s32.totalorder (!%p168_p3), %s1403_s9, 1  ;;  %s1455_s13 = sshll.u32 (!%p168_p3), %s1403_s9, 3  ;;  %vm258_vm0 = vcmask (!%p168_p3), 261120   ;;  %v1413_v0 = vmov (!%p168_p3), 0.0   ;;  %vm1414_vm1 = vmmov (!%p168_p3), 0  }
   0x7   : > { %171 = sbr.rel (%p168_p3) target bundleno = 5713 (0x1651), region = 28  ;;  %1246 = vmatprep.subr.bf16.mxu0 (!%p168_p3), %v1413_v0  ;;  %1250 = vmatprep.mubr.msk.bf16.mxu0 (!%p168_p3), %vm1414_vm1, %v1413_v0  ;;  %s1464_s15 = scalar_lea.vmem (!%p168_p3), [#allocation2], %s1455_s13 }
   0x8   : > { %259 = vst.msk [vmem:[%s1464_s15] sm:$0xff] (!%p168_p3), %vm258_vm0, %v1413_v0  ;;  %1254 = vmatprep.subr.bf16.mxu1 (!%p168_p3), %v1413_v0  ;;  %1258 = vmatprep.mubr.msk.bf16.mxu1 (!%p168_p3), %vm1414_vm1, %v1413_v0  ;;  %s1497_s20 = scalar_lea.vmem (!%p168_p3), [#allocation3], %s1455_s13  ;;  %s266_s22 = smul.u32 (!%p168_p3), 56, %s1403_s9 }
   0x9   : > { %261 = vst.msk [vmem:[%s1497_s20] sm:$0xff] (!%p168_p3), %vm258_vm0, %v1413_v0  ;;  %s1415_s27 = smov (!%p168_p3), 64   ;;  %s1416_s28 = smov (!%p168_p3), 32  }
   0xa   : > { %s1417_s29 = smov (!%p168_p3), 96   ;;  %s1185_s6 = smul.u32 (!%p168_p3), 40, %s1403_s9 }
   0xb   : > { %s1202_s24 = smul.u32 (!%p168_p3), 4294967272, %s1403_s9 }
   0xc   : > { %s1207_s3 = smul.u32 (!%p168_p3), 4294967256, %s1403_s9 }
   0xe   : > { %s1461_s14 = scalar_select %p215_p4, %s1403_s9, 1 }
   0xf   : > { %v268_v3 = vld [vmem:[%s1464_s15] sm:$0xff] }
  0x10   : > { %s1220_s16 = sshll.u32 %s1461_s14, 4  ;;  %v273_v4 = vpack.c.bf16 %v268_v3, %v268_v3  ;;  %s1219_s21 = sshll.u32 %s1461_s14, 6  ;;  %v270_v12 = vld [vmem:[%s1497_s20] sm:$0xff] }
  0x11   : > { %s232_s19 = scalar_lea.vmem %s1718_s1, %s1220_s16  ;;  %s1509_s25 = scalar_lea.vmem %s1717_s0, %s1219_s21 }
  0x12   : > { %v1476_v1 = vld [vmem:[%s232_s19] sm:$0xff]   ;;  %v1479_v2 = vld [vmem:[%s232_s19 + $0x8] sm:$0xff]   ;;  %s271_s26 = scalar_lea.vmem %s1509_s25, %s266_s22  ;;  %s1530_s4 = scalar_lea.vmem %s1719_s2, %s1219_s21 }
  0x13   : > { %1247 = vmatpush3.bf16.msra.mxu0 %v1476_v1  ;;  %1255 = vmatpush3.bf16.msra.mxu1 %v1476_v1  ;;  %v272_v5 = vld [vmem:[%s271_s26] sm:$0xff]  ;;  %s367_s5 = scalar_lea.vmem %s1530_s4, %s266_s22  ;;  %s1079_s7 = scalar_lea.vmem %s1509_s25, %s1185_s6 }
  0x14   : > { %1248 = vmatprep.subr.bf16.mxu0 %v1413_v0  ;;  %1256 = vmatprep.subr.bf16.mxu1 %v1413_v0  ;;  %v1186_v31 = vld [vmem:[%s1079_s7 + $0x8] sm:$0xff]  ;;  %s1083_s8 = scalar_lea.vmem %s1530_s4, %s1185_s6  ;;  %s1190_s14 = smul.u32 24, %s1403_s9 }
  0x15   : > { %s1094_s18 = scalar_lea.vmem %s1509_s25, %s1455_s13  ;;  %s1097_s19 = scalar_lea.vmem %s1530_s4, %s1455_s13 }
  0x16   : > { %s1087_s16 = scalar_lea.vmem %s1509_s25, %s1190_s14  ;;  %s1091_s17 = scalar_lea.vmem %s1530_s4, %s1190_s14 }
  0x17   : > { %1249 = vmatpush3.bf16.msra.mxu0 %v1479_v2  ;;  %1257 = vmatpush3.bf16.msra.mxu1 %v1479_v2  ;;  %v1191_v56 = vld [vmem:[%s1087_s16 + $0x10] sm:$0xff]  ;;  %s638_s21 = ssub.s32 4, %s1403_s9  ;;  %s1105_s26 = scalar_lea.vmem %s1509_s25, %s1202_s24 }
  0x18   : > { %1262 = vmatprep.subr.bf16.mxu0 %v1413_v0  ;;  %1270 = vmatprep.subr.bf16.mxu1 %v1413_v0  ;;  %s1624_s13 = sshll.u32 %s638_s21, 3  ;;  %s1109_s30 = scalar_lea.vmem %s1530_s4, %s1202_s24 }
  0x19   : > { %s642_s22 = scalar_lea.vmem %s1509_s25, %s1624_s13  ;;  %s725_s23 = scalar_lea.vmem %s1530_s4, %s1624_s13 }
  0x1a   : > { %1251 = vmatmul.mubr.msk.bf16.vlgmr.msra.gmra.mrb[0].mxu0 %vm258_vm0, %v273_v4  ;;  %s1117_s6 = scalar_lea.vmem %s1530_s4, %s1207_s3  ;;  %s1212_s7 = smul.u32 4294967240, %s1403_s9 }
  0x1b   : > { %1263 = vmatpush3.bf16.msra.mxu0 %v1476_v1  ;;  %1266 = vmatprep.mubr.msk.bf16.mxu0 %vm1414_vm1, %v1413_v0 }
  0x1c   : > { %1264 = vmatprep.subr.bf16.mxu0 %v1413_v0 }
  0x1f   : > { %1265 = vmatpush3.bf16.msra.mxu0 %v1479_v2 }
  0x20   : > { %1278 = vmatprep.subr.bf16.mxu0 %v1413_v0 }
  0xed   : > { %v324_v6 = vpop.f32.mrb[0].mxu0 }
  0xee   : > { %v330_v7 = vadd.f32 %v324_v6, %v272_v5  ;;  %v1252_v8 = vpop.f32.mrb[1].mxu0 }
  0xef   : > { %v327_v9 = vpop.f32.mrb[2].mxu0 }
  0xf0   : > { %1341 = vtanh.f32 %v330_v7  ;;  %v1253_v10 = vpop.f32.mrb[3].mxu0  ;;  %v331_v13 = vmul.f32 0.5, %v330_v7 }
  0xf2   : > { %1343 = vtanh.f32 %v331_v13 }
  0xfa   : > { %v1342_v11 = vpop.eup %1341 }
  0xfb   : > { %342 = vrot.lane.b32.xlu0 %v1342_v11, %s1415_s27 }
  0xfc   : > { %v1344_v14 = vpop.eup %1343 }
  0xfd   : > { %v333_v15 = vadd.f32 1.0, %v1344_v14 }
  0xff   : > { %337 = vrot.lane.b32.xlu0 %v270_v12, %s1416_s28  ;;  %v334_v16 = vmul.f32 0.5, %v333_v15 }
 0x16d   : > { %v343_v17 = vpop.permute.xlu0 %342 }
 0x16e   : > { %v345_v18 = vmul.f32 %v343_v17, %v334_v16 }
 0x170   : > { %347 = vrot.lane.b32.xlu1 %v345_v18, %s1416_s28 }
 0x171   : > { %v338_v19 = vpop.permute.xlu0 %337 }
 0x172   : > { %v340_v20 = vmul.f32 %v338_v19, %v334_v16 }
 0x1e2   : > { %v348_v21 = vpop.permute.xlu1 %347 }
 0x1e3   : > { %v350_v22 = vadd.f32 %v348_v21, %v340_v20  ;;  %v1196_v20 = vld [vmem:[%s1094_s18 + $0x18] sm:$0xff] }
 0x1e5   : > { %1345 = vtanh.f32 %v350_v22 }
 0x1ef   : > { %v1346_v23 = vpop.eup %1345 }
 0x1f0   : > { %353 = vrot.lane.b32.xlu1 %v1346_v23, %s1415_s27 }
 0x1f4   : > { %363 = vrot.lane.b32.xlu1 %v350_v22, %s1417_s29 }
 0x262   : > { %v354_v24 = vpop.permute.xlu1 %353 }
 0x263   : > { %v356_v25 = vmul.f32 %v354_v24, %v334_v16 }
 0x265   : > { %358 = vrot.lane.b32.xlu0 %v356_v25, %s1416_s28 }
 0x266   : > { %v364_v26 = vpop.permute.xlu1 %363 }
 0x267   : > { %366 = vst.msk [vmem:[%s1497_s20] sm:$0xff] %vm258_vm0, %v364_v26 }
 0x26e   : > { %v373_v27 = vld [vmem:[%s1497_s20] sm:$0xff] }
 0x26f   : > { %427 = vrot.lane.b32.xlu1 %v373_v27, %s1416_s28 }
 0x2d7   : > { %v359_v28 = vpop.permute.xlu0 %358 }
 0x2d8   : > { %361 = vst.msk [vmem:[%s1464_s15] sm:$0xff] %vm258_vm0, %v359_v28  ;;  %368 = vst.msk [vmem:[%s367_s5] sm:$0xff] %vm258_vm0, %v359_v28  ;;  %s1113_s5 = scalar_lea.vmem %s1509_s25, %s1207_s3 }
 0x2df   : > { %v372_v29 = vld [vmem:[%s1464_s15] sm:$0xff] }
 0x2e0   : > { %v376_v30 = vpack.c.bf16 %v372_v29, %v372_v29 }
 0x2e1   : > { %v428_v44 = vpop.permute.xlu1 %427 }
 0x2e2   : > { %1259 = vmatmul.mubr.msk.bf16.vlgmr.msra.gmra.mrb[0].mxu1 %vm258_vm0, %v376_v30 }
 0x2e3   : > { %1271 = vmatpush3.bf16.msra.mxu1 %v1476_v1  ;;  %1274 = vmatprep.mubr.msk.bf16.mxu1 %vm1414_vm1, %v1413_v0 }
 0x2e4   : > { %1272 = vmatprep.subr.bf16.mxu1 %v1413_v0 }
 0x2e7   : > { %1273 = vmatpush3.bf16.msra.mxu1 %v1479_v2 }
 0x2e8   : > { %1286 = vmatprep.subr.bf16.mxu1 %v1413_v0 }
 0x3b5   : > { %v414_v32 = vpop.f32.mrb[0].mxu1 }
 0x3b6   : > { %v420_v33 = vadd.f32 %v1186_v31, %v414_v32  ;;  %v1260_v34 = vpop.f32.mrb[1].mxu1 }
 0x3b7   : > { %v417_v35 = vpop.f32.mrb[2].mxu1 }
 0x3b8   : > { %1347 = vtanh.f32 %v420_v33  ;;  %v1261_v36 = vpop.f32.mrb[3].mxu1  ;;  %v421_v38 = vmul.f32 0.5, %v420_v33 }
 0x3ba   : > { %1349 = vtanh.f32 %v421_v38 }
 0x3c2   : > { %v1348_v37 = vpop.eup %1347 }
 0x3c3   : > { %432 = vrot.lane.b32.xlu0 %v1348_v37, %s1415_s27 }
 0x3c4   : > { %v1350_v39 = vpop.eup %1349 }
 0x3c5   : > { %v423_v40 = vadd.f32 1.0, %v1350_v39 }
 0x3c7   : > { %v424_v41 = vmul.f32 0.5, %v423_v40 }
 0x3c9   : > { %v430_v45 = vmul.f32 %v428_v44, %v424_v41 }
 0x435   : > { %v433_v42 = vpop.permute.xlu0 %432 }
 0x436   : > { %v435_v43 = vmul.f32 %v433_v42, %v424_v41 }
 0x438   : > { %437 = vrot.lane.b32.xlu0 %v435_v43, %s1416_s28 }
 0x4aa   : > { %v438_v46 = vpop.permute.xlu0 %437 }
 0x4ab   : > { %v440_v47 = vadd.f32 %v438_v46, %v430_v45  ;;  %v643_v45 = vld [vmem:[%s642_s22] sm:$0xff] }
 0x4ad   : > { %1351 = vtanh.f32 %v440_v47 }
 0x4b7   : > { %v1352_v48 = vpop.eup %1351 }
 0x4b8   : > { %443 = vrot.lane.b32.xlu1 %v1352_v48, %s1415_s27 }
 0x4bc   : > { %453 = vrot.lane.b32.xlu1 %v440_v47, %s1417_s29 }
 0x52a   : > { %v444_v49 = vpop.permute.xlu1 %443 }
 0x52b   : > { %v446_v50 = vmul.f32 %v444_v49, %v424_v41 }
 0x52d   : > { %448 = vrot.lane.b32.xlu0 %v446_v50, %s1416_s28 }
 0x52e   : > { %v454_v51 = vpop.permute.xlu1 %453 }
 0x52f   : > { %456 = vst.msk [vmem:[%s1497_s20] sm:$0xff] %vm258_vm0, %v454_v51 }
 0x536   : > { %v463_v52 = vld [vmem:[%s1497_s20] sm:$0xff] }
 0x537   : > { %517 = vrot.lane.b32.xlu1 %v463_v52, %s1416_s28 }
 0x59f   : > { %v449_v53 = vpop.permute.xlu0 %448 }
 0x5a0   : > { %451 = vst.msk [vmem:[%s1464_s15] sm:$0xff] %vm258_vm0, %v449_v53  ;;  %1189 = vst.msk [vmem:[%s1083_s8 + $0x8] sm:$0xff] %vm258_vm0, %v449_v53  ;;  %s1121_s8 = scalar_lea.vmem %s1509_s25, %s1212_s7  ;;  %s1125_s25 = scalar_lea.vmem %s1530_s4, %s1212_s7 }
 0x5a7   : > { %v462_v54 = vld [vmem:[%s1464_s15] sm:$0xff] }
 0x5a8   : > { %v466_v55 = vpack.c.bf16 %v462_v54, %v462_v54 }
 0x5a9   : > { %v518_v8 = vpop.permute.xlu1 %517 }
 0x5aa   : > { %1267 = vmatmul.mubr.msk.bf16.vlgmr.msra.gmra.mrb[4].mxu0 %vm258_vm0, %v466_v55 }
 0x5ab   : > { %1279 = vmatpush3.bf16.msra.mxu0 %v1476_v1  ;;  %1282 = vmatprep.mubr.msk.bf16.mxu0 %vm1414_vm1, %v1413_v0 }
 0x5ac   : > { %1280 = vmatprep.subr.bf16.mxu0 %v1413_v0 }
 0x5af   : > { %1281 = vmatpush3.bf16.msra.mxu0 %v1479_v2 }
 0x5b0   : > { %1294 = vmatprep.subr.bf16.mxu0 %v1413_v0 }
 0x67d   : > { %v504_v57 = vpop.f32.mrb[4].mxu0 }
 0x67e   : > { %v510_v58 = vadd.f32 %v1191_v56, %v504_v57  ;;  %v1268_v59 = vpop.f32.mrb[5].mxu0 }
 0x67f   : > { %v507_v60 = vpop.f32.mrb[6].mxu0 }
 0x680   : > { %1353 = vtanh.f32 %v510_v58  ;;  %v1269_v61 = vpop.f32.mrb[7].mxu0  ;;  %v511_v63 = vmul.f32 0.5, %v510_v58 }
 0x682   : > { %1355 = vtanh.f32 %v511_v63 }
 0x68a   : > { %v1354_v62 = vpop.eup %1353 }
 0x68b   : > { %522 = vrot.lane.b32.xlu0 %v1354_v62, %s1415_s27 }
 0x68c   : > { %v1356_v3 = vpop.eup %1355 }
 0x68d   : > { %v513_v4 = vadd.f32 1.0, %v1356_v3 }
 0x68f   : > { %v514_v5 = vmul.f32 0.5, %v513_v4 }
 0x691   : > { %v520_v9 = vmul.f32 %v518_v8, %v514_v5 }
 0x6fd   : > { %v523_v6 = vpop.permute.xlu0 %522 }
 0x6fe   : > { %v525_v7 = vmul.f32 %v523_v6, %v514_v5 }
 0x700   : > { %527 = vrot.lane.b32.xlu0 %v525_v7, %s1416_s28 }
 0x772   : > { %v528_v10 = vpop.permute.xlu0 %527 }
 0x773   : > { %v530_v11 = vadd.f32 %v528_v10, %v520_v9  ;;  %v1203_v9 = vld [vmem:[%s1105_s26 + $0x28] sm:$0xff] }
 0x775   : > { %1357 = vtanh.f32 %v530_v11 }
 0x77f   : > { %v1358_v12 = vpop.eup %1357 }
 0x780   : > { %533 = vrot.lane.b32.xlu1 %v1358_v12, %s1415_s27 }
 0x784   : > { %543 = vrot.lane.b32.xlu1 %v530_v11, %s1417_s29 }
 0x7f2   : > { %v534_v13 = vpop.permute.xlu1 %533 }
 0x7f3   : > { %v536_v14 = vmul.f32 %v534_v13, %v514_v5 }
 0x7f5   : > { %538 = vrot.lane.b32.xlu0 %v536_v14, %s1416_s28 }
 0x7f6   : > { %v544_v15 = vpop.permute.xlu1 %543 }
 0x7f7   : > { %546 = vst.msk [vmem:[%s1497_s20] sm:$0xff] %vm258_vm0, %v544_v15 }
 0x7fe   : > { %v552_v16 = vld [vmem:[%s1497_s20] sm:$0xff] }
 0x7ff   : > { %606 = vrot.lane.b32.xlu1 %v552_v16, %s1416_s28 }
 0x867   : > { %v539_v17 = vpop.permute.xlu0 %538 }
 0x868   : > { %541 = vst.msk [vmem:[%s1464_s15] sm:$0xff] %vm258_vm0, %v539_v17  ;;  %1194 = vst.msk [vmem:[%s1091_s17 + $0x10] sm:$0xff] %vm258_vm0, %v539_v17 }
 0x86f   : > { %v551_v18 = vld [vmem:[%s1464_s15] sm:$0xff] }
 0x870   : > { %v555_v19 = vpack.c.bf16 %v551_v18, %v551_v18 }
 0x871   : > { %v607_v33 = vpop.permute.xlu1 %606 }
 0x872   : > { %1275 = vmatmul.mubr.msk.bf16.vlgmr.msra.gmra.mrb[4].mxu1 %vm258_vm0, %v555_v19 }
 0x873   : > { %1287 = vmatpush3.bf16.msra.mxu1 %v1476_v1  ;;  %1290 = vmatprep.mubr.msk.bf16.mxu1 %vm1414_vm1, %v1413_v0 }
 0x874   : > { %1288 = vmatprep.subr.bf16.mxu1 %v1413_v0 }
 0x877   : > { %1289 = vmatpush3.bf16.msra.mxu1 %v1479_v2 }
 0x878   : > { %1302 = vmatprep.subr.bf16.mxu1 %v1413_v0 }
 0x945   : > { %v593_v21 = vpop.f32.mrb[4].mxu1 }
 0x946   : > { %v599_v22 = vadd.f32 %v1196_v20, %v593_v21  ;;  %v1276_v23 = vpop.f32.mrb[5].mxu1 }
 0x947   : > { %v596_v24 = vpop.f32.mrb[6].mxu1 }
 0x948   : > { %1359 = vtanh.f32 %v599_v22  ;;  %v1277_v25 = vpop.f32.mrb[7].mxu1  ;;  %v600_v27 = vmul.f32 0.5, %v599_v22 }
 0x94a   : > { %1361 = vtanh.f32 %v600_v27 }
 0x952   : > { %v1360_v26 = vpop.eup %1359 }
 0x953   : > { %611 = vrot.lane.b32.xlu0 %v1360_v26, %s1415_s27 }
 0x954   : > { %v1362_v28 = vpop.eup %1361 }
 0x955   : > { %v602_v29 = vadd.f32 1.0, %v1362_v28 }
 0x957   : > { %v603_v30 = vmul.f32 0.5, %v602_v29 }
 0x959   : > { %v609_v34 = vmul.f32 %v607_v33, %v603_v30 }
 0x9c5   : > { %v612_v31 = vpop.permute.xlu0 %611 }
 0x9c6   : > { %v614_v32 = vmul.f32 %v612_v31, %v603_v30  ;;  %v1208_v31 = vld [vmem:[%s1113_s5 + $0x30] sm:$0xff] }
 0x9c8   : > { %616 = vrot.lane.b32.xlu0 %v614_v32, %s1416_s28 }
 0xa3a   : > { %v617_v35 = vpop.permute.xlu0 %616 }
 0xa3b   : > { %v619_v36 = vadd.f32 %v617_v35, %v609_v34 }
 0xa3d   : > { %1363 = vtanh.f32 %v619_v36 }
 0xa47   : > { %v1364_v37 = vpop.eup %1363 }
 0xa48   : > { %622 = vrot.lane.b32.xlu1 %v1364_v37, %s1415_s27 }
 0xa4c   : > { %632 = vrot.lane.b32.xlu1 %v619_v36, %s1417_s29 }
 0xaba   : > { %v623_v38 = vpop.permute.xlu1 %622 }
 0xabb   : > { %v625_v39 = vmul.f32 %v623_v38, %v603_v30 }
 0xabd   : > { %627 = vrot.lane.b32.xlu0 %v625_v39, %s1416_s28 }
 0xabe   : > { %v633_v40 = vpop.permute.xlu1 %632 }
 0xabf   : > { %635 = vst.msk [vmem:[%s1497_s20] sm:$0xff] %vm258_vm0, %v633_v40 }
 0xac6   : > { %v641_v41 = vld [vmem:[%s1497_s20] sm:$0xff] }
 0xac7   : > { %695 = vrot.lane.b32.xlu1 %v641_v41, %s1416_s28 }
 0xb2f   : > { %v628_v42 = vpop.permute.xlu0 %627 }
 0xb30   : > { %630 = vst.msk [vmem:[%s1464_s15] sm:$0xff] %vm258_vm0, %v628_v42  ;;  %1199 = vst.msk [vmem:[%s1097_s19 + $0x18] sm:$0xff] %vm258_vm0, %v628_v42 }
 0xb37   : > { %v640_v43 = vld [vmem:[%s1464_s15] sm:$0xff] }
 0xb38   : > { %v644_v44 = vpack.c.bf16 %v640_v43, %v640_v43 }
 0xb39   : > { %v696_v58 = vpop.permute.xlu1 %695 }
 0xb3a   : > { %1283 = vmatmul.mubr.msk.bf16.vlgmr.msra.gmra.mrb[8].mxu0 %vm258_vm0, %v644_v44 }
 0xb3b   : > { %1295 = vmatpush3.bf16.msra.mxu0 %v1476_v1  ;;  %1298 = vmatprep.mubr.msk.bf16.mxu0 %vm1414_vm1, %v1413_v0 }
 0xb3c   : > { %1296 = vmatprep.subr.bf16.mxu0 %v1413_v0 }
 0xb3f   : > { %1297 = vmatpush3.bf16.msra.mxu0 %v1479_v2 }
 0xc0d   : > { %v682_v46 = vpop.f32.mrb[8].mxu0 }
 0xc0e   : > { %v688_v47 = vadd.f32 %v682_v46, %v643_v45  ;;  %v1284_v48 = vpop.f32.mrb[9].mxu0 }
 0xc0f   : > { %v685_v49 = vpop.f32.mrb[10].mxu0 }
 0xc10   : > { %1365 = vtanh.f32 %v688_v47  ;;  %v1285_v50 = vpop.f32.mrb[11].mxu0  ;;  %v689_v52 = vmul.f32 0.5, %v688_v47 }
 0xc12   : > { %1367 = vtanh.f32 %v689_v52 }
 0xc1a   : > { %v1366_v51 = vpop.eup %1365 }
 0xc1b   : > { %700 = vrot.lane.b32.xlu0 %v1366_v51, %s1415_s27 }
 0xc1c   : > { %v1368_v53 = vpop.eup %1367 }
 0xc1d   : > { %v691_v54 = vadd.f32 1.0, %v1368_v53 }
 0xc1f   : > { %v692_v55 = vmul.f32 0.5, %v691_v54 }
 0xc21   : > { %v698_v59 = vmul.f32 %v696_v58, %v692_v55 }
 0xc8d   : > { %v701_v56 = vpop.permute.xlu0 %700 }
 0xc8e   : > { %v703_v57 = vmul.f32 %v701_v56, %v692_v55  ;;  %v1213_v56 = vld [vmem:[%s1121_s8 + $0x38] sm:$0xff] }
 0xc90   : > { %705 = vrot.lane.b32.xlu0 %v703_v57, %s1416_s28 }
 0xd02   : > { %v706_v60 = vpop.permute.xlu0 %705 }
 0xd03   : > { %v708_v61 = vadd.f32 %v706_v60, %v698_v59 }
 0xd05   : > { %1369 = vtanh.f32 %v708_v61 }
 0xd0f   : > { %v1370_v62 = vpop.eup %1369 }
 0xd10   : > { %711 = vrot.lane.b32.xlu1 %v1370_v62, %s1415_s27 }
 0xd14   : > { %721 = vrot.lane.b32.xlu1 %v708_v61, %s1417_s29 }
 0xd82   : > { %v712_v63 = vpop.permute.xlu1 %711 }
 0xd83   : > { %v714_v3 = vmul.f32 %v712_v63, %v692_v55 }
 0xd85   : > { %716 = vrot.lane.b32.xlu0 %v714_v3, %s1416_s28 }
 0xd86   : > { %v722_v4 = vpop.permute.xlu1 %721 }
 0xd87   : > { %724 = vst.msk [vmem:[%s1497_s20] sm:$0xff] %vm258_vm0, %v722_v4 }
 0xd8e   : > { %v731_v5 = vld [vmem:[%s1497_s20] sm:$0xff] }
 0xd8f   : > { %785 = vrot.lane.b32.xlu1 %v731_v5, %s1416_s28 }
 0xdf7   : > { %v717_v6 = vpop.permute.xlu0 %716 }
 0xdf8   : > { %719 = vst.msk [vmem:[%s1464_s15] sm:$0xff] %vm258_vm0, %v717_v6  ;;  %726 = vst.msk [vmem:[%s725_s23] sm:$0xff] %vm258_vm0, %v717_v6 }
 0xdff   : > { %v730_v7 = vld [vmem:[%s1464_s15] sm:$0xff] }
 0xe00   : > { %v734_v8 = vpack.c.bf16 %v730_v7, %v730_v7 }
 0xe01   : > { %v786_v19 = vpop.permute.xlu1 %785 }
 0xe02   : > { %1291 = vmatmul.mubr.msk.bf16.vlgmr.msra.gmra.mrb[8].mxu1 %vm258_vm0, %v734_v8 }
 0xe03   : > { %1303 = vmatpush3.bf16.msra.mxu1 %v1476_v1  ;;  %1306 = vmatprep.mubr.msk.bf16.mxu1 %vm1414_vm1, %v1413_v0 }
 0xe04   : > { %1304 = vmatprep.subr.bf16.mxu1 %v1413_v0 }
 0xe07   : > { %1305 = vmatpush3.bf16.msra.mxu1 %v1479_v2 }
 0xed5   : > { %v772_v10 = vpop.f32.mrb[8].mxu1 }
 0xed6   : > { %v778_v11 = vadd.f32 %v1203_v9, %v772_v10  ;;  %v1292_v12 = vpop.f32.mrb[9].mxu1 }
 0xed7   : > { %v775_v13 = vpop.f32.mrb[10].mxu1 }
 0xed8   : > { %1371 = vtanh.f32 %v778_v11  ;;  %v1293_v14 = vpop.f32.mrb[11].mxu1  ;;  %v779_v1 = vmul.f32 0.5, %v778_v11 }
 0xeda   : > { %1373 = vtanh.f32 %v779_v1 }
 0xee2   : > { %v1372_v15 = vpop.eup %1371 }
 0xee3   : > { %790 = vrot.lane.b32.xlu0 %v1372_v15, %s1415_s27 }
 0xee4   : > { %v1374_v16 = vpop.eup %1373 }
 0xee5   : > { %v781_v17 = vadd.f32 1.0, %v1374_v16 }
 0xee7   : > { %v782_v0 = vmul.f32 0.5, %v781_v17 }
 0xee9   : > { %v788_v20 = vmul.f32 %v786_v19, %v782_v0 }
 0xf55   : > { %v791_v2 = vpop.permute.xlu0 %790 }
 0xf56   : > { %v793_v18 = vmul.f32 %v791_v2, %v782_v0 }
 0xf58   : > { %795 = vrot.lane.b32.xlu0 %v793_v18, %s1416_s28 }
 0xfca   : > { %v796_v21 = vpop.permute.xlu0 %795 }
 0xfcb   : > { %v798_v22 = vadd.f32 %v796_v21, %v788_v20 }
 0xfcd   : > { %1375 = vtanh.f32 %v798_v22 }
 0xfd7   : > { %v1376_v23 = vpop.eup %1375 }
 0xfd8   : > { %801 = vrot.lane.b32.xlu1 %v1376_v23, %s1415_s27 }
 0xfdc   : > { %811 = vrot.lane.b32.xlu1 %v798_v22, %s1417_s29 }
0x104a   : > { %v802_v24 = vpop.permute.xlu1 %801 }
0x104b   : > { %v804_v25 = vmul.f32 %v802_v24, %v782_v0 }
0x104d   : > { %806 = vrot.lane.b32.xlu0 %v804_v25, %s1416_s28 }
0x104e   : > { %v812_v26 = vpop.permute.xlu1 %811 }
0x104f   : > { %814 = vst.msk [vmem:[%s1497_s20] sm:$0xff] %vm258_vm0, %v812_v26 }
0x1056   : > { %v821_v27 = vld [vmem:[%s1497_s20] sm:$0xff] }
0x1057   : > { %875 = vrot.lane.b32.xlu1 %v821_v27, %s1416_s28 }
0x10bf   : > { %v807_v28 = vpop.permute.xlu0 %806 }
0x10c0   : > { %809 = vst.msk [vmem:[%s1464_s15] sm:$0xff] %vm258_vm0, %v807_v28  ;;  %1206 = vst.msk [vmem:[%s1109_s30 + $0x28] sm:$0xff] %vm258_vm0, %v807_v28 }
0x10c7   : > { %v820_v29 = vld [vmem:[%s1464_s15] sm:$0xff] }
0x10c8   : > { %v824_v30 = vpack.c.bf16 %v820_v29, %v820_v29 }
0x10c9   : > { %v876_v44 = vpop.permute.xlu1 %875 }
0x10ca   : > { %1299 = vmatmul.mubr.msk.bf16.vlgmr.msra.gmra.mrb[12].mxu0 %vm258_vm0, %v824_v30 }
0x119d   : > { %v862_v32 = vpop.f32.mrb[12].mxu0 }
0x119e   : > { %v868_v33 = vadd.f32 %v1208_v31, %v862_v32  ;;  %v1300_v34 = vpop.f32.mrb[13].mxu0 }
0x119f   : > { %v865_v35 = vpop.f32.mrb[14].mxu0 }
0x11a0   : > { %1377 = vtanh.f32 %v868_v33  ;;  %v1301_v36 = vpop.f32.mrb[15].mxu0  ;;  %v869_v38 = vmul.f32 0.5, %v868_v33 }
0x11a2   : > { %1379 = vtanh.f32 %v869_v38 }
0x11aa   : > { %v1378_v37 = vpop.eup %1377 }
0x11ab   : > { %880 = vrot.lane.b32.xlu0 %v1378_v37, %s1415_s27 }
0x11ac   : > { %v1380_v39 = vpop.eup %1379 }
0x11ad   : > { %v871_v40 = vadd.f32 1.0, %v1380_v39 }
0x11af   : > { %v872_v41 = vmul.f32 0.5, %v871_v40 }
0x11b1   : > { %v878_v45 = vmul.f32 %v876_v44, %v872_v41 }
0x121d   : > { %v881_v42 = vpop.permute.xlu0 %880 }
0x121e   : > { %v883_v43 = vmul.f32 %v881_v42, %v872_v41 }
0x1220   : > { %885 = vrot.lane.b32.xlu0 %v883_v43, %s1416_s28 }
0x1292   : > { %v886_v46 = vpop.permute.xlu0 %885 }
0x1293   : > { %v888_v47 = vadd.f32 %v886_v46, %v878_v45 }
0x1295   : > { %1381 = vtanh.f32 %v888_v47 }
0x129f   : > { %v1382_v48 = vpop.eup %1381 }
0x12a0   : > { %891 = vrot.lane.b32.xlu1 %v1382_v48, %s1415_s27 }
0x12a4   : > { %901 = vrot.lane.b32.xlu1 %v888_v47, %s1417_s29 }
0x1312   : > { %v892_v49 = vpop.permute.xlu1 %891 }
0x1313   : > { %v894_v50 = vmul.f32 %v892_v49, %v872_v41 }
0x1315   : > { %896 = vrot.lane.b32.xlu0 %v894_v50, %s1416_s28 }
0x1316   : > { %v902_v51 = vpop.permute.xlu1 %901 }
0x1317   : > { %904 = vst.msk [vmem:[%s1497_s20] sm:$0xff] %vm258_vm0, %v902_v51 }
0x131e   : > { %v911_v52 = vld [vmem:[%s1497_s20] sm:$0xff] }
0x131f   : > { %965 = vrot.lane.b32.xlu1 %v911_v52, %s1416_s28 }
0x1387   : > { %v897_v53 = vpop.permute.xlu0 %896 }
0x1388   : > { %899 = vst.msk [vmem:[%s1464_s15] sm:$0xff] %vm258_vm0, %v897_v53  ;;  %1211 = vst.msk [vmem:[%s1117_s6 + $0x30] sm:$0xff] %vm258_vm0, %v897_v53 }
0x138f   : > { %v910_v54 = vld [vmem:[%s1464_s15] sm:$0xff] }
0x1390   : > { %v914_v55 = vpack.c.bf16 %v910_v54, %v910_v54 }
0x1391   : > { %v966_v8 = vpop.permute.xlu1 %965 }
0x1392   : > { %1307 = vmatmul.mubr.msk.bf16.vlgmr.msra.gmra.mrb[12].mxu1 %vm258_vm0, %v914_v55 }
0x1465   : > { %v952_v57 = vpop.f32.mrb[12].mxu1 }
0x1466   : > { %v958_v58 = vadd.f32 %v1213_v56, %v952_v57  ;;  %v1308_v59 = vpop.f32.mrb[13].mxu1 }
0x1467   : > { %v955_v60 = vpop.f32.mrb[14].mxu1 }
0x1468   : > { %1383 = vtanh.f32 %v958_v58  ;;  %v1309_v61 = vpop.f32.mrb[15].mxu1  ;;  %v959_v63 = vmul.f32 0.5, %v958_v58 }
0x146a   : > { %1385 = vtanh.f32 %v959_v63 }
0x1472   : > { %v1384_v62 = vpop.eup %1383 }
0x1473   : > { %970 = vrot.lane.b32.xlu0 %v1384_v62, %s1415_s27 }
0x1474   : > { %v1386_v3 = vpop.eup %1385 }
0x1475   : > { %v961_v4 = vadd.f32 1.0, %v1386_v3 }
0x1477   : > { %v962_v5 = vmul.f32 0.5, %v961_v4 }
0x1479   : > { %v968_v9 = vmul.f32 %v966_v8, %v962_v5 }
0x14e5   : > { %v971_v6 = vpop.permute.xlu0 %970 }
0x14e6   : > { %v973_v7 = vmul.f32 %v971_v6, %v962_v5 }
0x14e8   : > { %975 = vrot.lane.b32.xlu0 %v973_v7, %s1416_s28 }
0x155a   : > { %v976_v10 = vpop.permute.xlu0 %975 }
0x155b   : > { %v978_v11 = vadd.f32 %v976_v10, %v968_v9 }
0x155d   : > { %1387 = vtanh.f32 %v978_v11 }
0x1567   : > { %v1388_v12 = vpop.eup %1387 }
0x1568   : > { %981 = vrot.lane.b32.xlu1 %v1388_v12, %s1415_s27 }
0x156c   : > { %991 = vrot.lane.b32.xlu1 %v978_v11, %s1417_s29 }
0x15da   : > { %v982_v13 = vpop.permute.xlu1 %981 }
0x15db   : > { %v984_v14 = vmul.f32 %v982_v13, %v962_v5 }
0x15dd   : > { %986 = vrot.lane.b32.xlu0 %v984_v14, %s1416_s28 }
0x15de   : > { %v992_v15 = vpop.permute.xlu1 %991 }
0x15df   : > { %994 = vst.msk [vmem:[%s1497_s20] sm:$0xff] %vm258_vm0, %v992_v15 }
0x164f   : > { %v987_v1 = vpop.permute.xlu0 %986 }
0x1650   : > { %989 = vst.msk [vmem:[%s1464_s15] sm:$0xff] %vm258_vm0, %v987_v1  ;;  %1216 = vst.msk [vmem:[%s1125_s25 + $0x38] sm:$0xff] %vm258_vm0, %v987_v1 }
0x1651 PF: > { %s12_s11 = sadd.s32 1, %s1411_s11   ;;  %s1720_s9 = smov %s1407_s10 }
0x1652   : > { %p9_p5 = scmp.ge.s32.totalorder %s12_s11, 4   ;;  %s1721_s10 = smov %s1723_s12 }
0x1654   :  { %11 = sbr.rel (!%p9_p5) target bundleno = 2 (0x2), region = 85 }

</bundles_post_ra>
